<compile_context>
chip_gen: v7x
topology: tpu7x:2x2x1
jax: 0.10.0
libtpu: 0.0.40
codegen_flags: <defaults>
</compile_context>

<pallas_src>
import jax
import jax.numpy as jnp
from jax.experimental import pallas as pl
from jax.experimental.pallas import tpu as pltpu

D_IN = 784          # native K of the first matmul (no HBM-side padding)
H1 = 128
H2 = 64
H2_PAD = 128        # hidden2 padded to a lane-full 128 (VMEM-only, numerically exact)
NUM_CLASSES = 10    # kernel writes the narrow 10-lane output directly


def mnist_mlp_kernel(x_ref, w1_ref, b1_ref, w2_ref, b2_ref, w3_ref, b3_ref, out_ref):
    # Entire forward pass fused in VMEM: two Linear+ReLU layers, one Linear out layer.
    x = x_ref[...]                                                          # [TB, 784]

    h1 = jnp.dot(x, w1_ref[...], preferred_element_type=jnp.float32)       # [TB, 128] f32
    h1 = jnp.maximum(h1 + b1_ref[...], 0.0)                                 # ReLU

    h2 = jnp.dot(h1.astype(w2_ref.dtype), w2_ref[...],
                 preferred_element_type=jnp.float32)                        # [TB, 128] f32
    h2 = jnp.maximum(h2 + b2_ref[...], 0.0)                                 # ReLU (pad lanes stay 0)

    logits = jnp.dot(h2.astype(w3_ref.dtype), w3_ref[...],
                     preferred_element_type=jnp.float32)                    # [TB, 10] f32
    out_ref[...] = (logits + b3_ref[...]).astype(out_ref.dtype)


def _round_up(n, m):
    return ((n + m - 1) // m) * m


def _default_tile_batch():
    """Generation-aware default batch tile (f32 footprint stays inside default scoped VMEM)."""
    try:
        kind = jax.devices()[0].device_kind.lower()
    except Exception:
        return 1024
    if ("v6" in kind) or ("v7" in kind):
        return 2048   # ~14 MB double-buffered x + out + resident weights < 32 MiB default
    return 1024       # v5e/v4/older: ~7.4 MB, safely under the 16 MiB default scoped VMEM


def _prep_params(params, compute_dtype):
    """Lane-dense, numerically exact parameter prep. Only hidden2 is padded (64 -> 128)."""
    w1 = params["w1"].astype(compute_dtype)                                          # [784, 128]
    b1 = params["b1"].reshape(1, H1).astype(jnp.float32)                             # [1, 128]
    w2 = jnp.pad(params["w2"], ((0, 0), (0, H2_PAD - H2))).astype(compute_dtype)     # [128, 128]
    b2 = jnp.pad(params["b2"].reshape(1, H2), ((0, 0), (0, H2_PAD - H2)))            # [1, 128] f32
    w3 = jnp.pad(params["w3"], ((0, H2_PAD - H2), (0, 0))).astype(compute_dtype)     # [128, 10]
    b3 = params["b3"].reshape(1, NUM_CLASSES).astype(jnp.float32)                    # [1, 10]
    return w1, b1, w2, b2, w3, b3


def mnist_net_forward(x, params, *, tb=None, compute_dtype=jnp.float32):
    """x: [B, 784] float32. params: dict of w1,b1,w2,b2,w3,b3. Returns [B, 10] float32 logits.

    tb: max batch tile (multiple of 8). None -> generation-aware default.
    compute_dtype: dtype streamed to the MXU for x and the weights (biases/accumulation
    stay f32). jnp.bfloat16 roughly halves HBM traffic at ~1e-2-level deviation.
    """
    B, d_in = x.shape
    assert d_in == D_IN
    if tb is None:
        tb = _default_tile_batch()
    assert tb % 8 == 0, "batch tile must be a multiple of 8 (sublane)"

    # Sublane multiple depends on the streamed dtype (8 for f32, 16 for bf16, 32 for int8).
    sublane = 8 * max(1, 4 // jnp.dtype(compute_dtype).itemsize)

    # Balance the tile across grid steps so padding never balloons; any B that is a
    # multiple of `sublane` runs with zero wrapper-side padding (no extra HBM pass).
    num_tiles = -(-B // tb)                                   # ceil(B / tb)
    tb_eff = _round_up(-(-B // num_tiles), sublane)           # ceil(B / num_tiles) -> sublane mult
    b_pad = num_tiles * tb_eff

    x = x.astype(compute_dtype)
    if b_pad != B:
        x = jnp.pad(x, ((0, b_pad - B), (0, 0)))              # rows only, never columns

    w1, b1, w2, b2, w3, b3 = _prep_params(params, compute_dtype)

    def batch_map(i):
        return (i, 0)

    def replicated_map(i):
        return (0, 0)

    # Weights/biases have constant index maps -> fetched once, resident across the grid.
    # (If VMEM ever gets tight — e.g. very large tb on v5e — pipeline_mode=pl.Buffered(1)
    #  on these six specs reclaims their second pipeline buffer; not needed at these sizes.)
    out_padded = pl.pallas_call(
        mnist_mlp_kernel,
        out_shape=jax.ShapeDtypeStruct((b_pad, NUM_CLASSES), jnp.float32),
        grid_spec=pltpu.PrefetchScalarGridSpec(
            num_scalar_prefetch=0,
            grid=(num_tiles,),
            in_specs=[
                pl.BlockSpec((tb_eff, D_IN), batch_map),          # x tile (only streaming input)
                pl.BlockSpec((D_IN, H1), replicated_map),         # w1
                pl.BlockSpec((1, H1), replicated_map),            # b1
                pl.BlockSpec((H1, H2_PAD), replicated_map),       # w2
                pl.BlockSpec((1, H2_PAD), replicated_map),        # b2
                pl.BlockSpec((H2_PAD, NUM_CLASSES), replicated_map),  # w3
                pl.BlockSpec((1, NUM_CLASSES), replicated_map),   # b3
            ],
            out_specs=pl.BlockSpec((tb_eff, NUM_CLASSES), batch_map),
        ),
        compiler_params=pltpu.CompilerParams(
            # TODO(synk): on v7x, confirm via profile that the batch axis actually shards
            # across both TensorCores; if one TC idles, switch to pltpu.CORE_PARALLEL.
            dimension_semantics=("parallel",),
        ),
    )(x, w1, b1, w2, b2, w3, b3)

    return out_padded if b_pad == B else out_padded[:B]


def init_params(key):
    """Deterministic synthetic init (same shapes as nn.Linear(784,128)/(128,64)/(64,10))."""
    k1, k2, k3 = jax.random.split(key, 3)

    def linear(k, fan_in, fan_out):
        # Kaiming-uniform-like bound, as in torch.nn.Linear default init.
        bound = 1.0 / jnp.sqrt(float(fan_in))
        kw, kb = jax.random.split(k)
        w = jax.random.uniform(kw, (fan_in, fan_out), jnp.float32, -bound, bound)
        b = jax.random.uniform(kb, (1, fan_out), jnp.float32, -bound, bound)
        return w, b

    w1, b1 = linear(k1, D_IN, H1)
    w2, b2 = linear(k2, H1, H2)
    w3, b3 = linear(k3, H2, NUM_CLASSES)
    return {"w1": w1, "b1": b1, "w2": w2, "b2": b2, "w3": w3, "b3": b3}


def reference_forward(x, p):
    h1 = jnp.maximum(x @ p["w1"] + p["b1"], 0.0)
    h2 = jnp.maximum(h1 @ p["w2"] + p["b2"], 0.0)
    return h2 @ p["w3"] + p["b3"]


if __name__ == "__main__":
    key = jax.random.PRNGKey(0)
    kx1, kx2, kp = jax.random.split(key, 3)
    params = init_params(kp)

    # Ragged batch (B not a multiple of 8) -> exercises the row-pad path.
    B1 = 100
    x1 = jax.random.normal(kx1, (B1, D_IN), dtype=jnp.float32)
    out1 = jax.block_until_ready(mnist_net_forward(x1, params))
    ref1 = reference_forward(x1, params)
    assert out1.shape == (B1, NUM_CLASSES)
    assert jnp.allclose(out1, ref1, atol=1e-4, rtol=1e-4), "mismatch vs JAX reference (ragged B)"

    # Sublane-aligned batch -> exercises the zero-copy (no jnp.pad at all) path.
    B2 = 64
    x2 = jax.random.normal(kx2, (B2, D_IN), dtype=jnp.float32)
    out2 = jax.block_until_ready(mnist_net_forward(x2, params))
    ref2 = reference_forward(x2, params)
    assert out2.shape == (B2, NUM_CLASSES)
    assert jnp.allclose(out2, ref2, atol=1e-4, rtol=1e-4), "mismatch vs JAX reference (aligned B)"

    print("KERNEL_OK")
</pallas_src>

<mosaic_0001>
module attributes {stable_mosaic.version = 11 : i64} {
  func.func @mnist_mlp_kernel(%arg0: i32, %arg1: memref<104x784xf32, #tpu.memory_space<vmem>>, %arg2: memref<784x128xf32, #tpu.memory_space<vmem>>, %arg3: memref<1x128xf32, #tpu.memory_space<vmem>>, %arg4: memref<128x128xf32, #tpu.memory_space<vmem>>, %arg5: memref<1x128xf32, #tpu.memory_space<vmem>>, %arg6: memref<128x10xf32, #tpu.memory_space<vmem>>, %arg7: memref<1x10xf32, #tpu.memory_space<vmem>>, %arg8: memref<104x10xf32, #tpu.memory_space<vmem>>) attributes {dimension_semantics = [#tpu.dimension_semantics<parallel>], iteration_bounds = array<i64: 1>, scalar_prefetch = 0 : i64, scratch_operands = 0 : i64, tpu.core_type = #tpu.core_type<tc>, window_params = [{transform_indices = @transform_0, window_bounds = array<i64: 104, 784>}, {pipeline_mode = #tpu.pipeline_mode<synchronous>, transform_indices = @transform_1, window_bounds = array<i64: 784, 128>}, {pipeline_mode = #tpu.pipeline_mode<synchronous>, transform_indices = @transform_2, window_bounds = array<i64: 1, 128>}, {pipeline_mode = #tpu.pipeline_mode<synchronous>, transform_indices = @transform_3, window_bounds = array<i64: 128, 128>}, {pipeline_mode = #tpu.pipeline_mode<synchronous>, transform_indices = @transform_4, window_bounds = array<i64: 1, 128>}, {pipeline_mode = #tpu.pipeline_mode<synchronous>, transform_indices = @transform_5, window_bounds = array<i64: 128, 10>}, {pipeline_mode = #tpu.pipeline_mode<synchronous>, transform_indices = @transform_6, window_bounds = array<i64: 1, 10>}, {transform_indices = @transform_7, window_bounds = array<i64: 104, 10>}]} {
    %c0 = arith.constant 0 : index
    %c0_0 = arith.constant 0 : index
    %0 = vector.load %arg1[%c0, %c0_0] : memref<104x784xf32, #tpu.memory_space<vmem>>, vector<104x784xf32>
    %c0_1 = arith.constant 0 : index
    %c0_2 = arith.constant 0 : index
    %1 = vector.load %arg2[%c0_1, %c0_2] : memref<784x128xf32, #tpu.memory_space<vmem>>, vector<784x128xf32>
    %cst = arith.constant dense<0.000000e+00> : vector<104x128xf32>
    %2 = tpu.matmul %0, %1, %cst {dimension_numbers = #tpu.dot_dimension_numbers<[1], [0], [0], [1], [0, 0, 1, 1], [], []>} : vector<104x784xf32>, vector<784x128xf32>, vector<104x128xf32> -> vector<104x128xf32>
    %c0_3 = arith.constant 0 : index
    %c0_4 = arith.constant 0 : index
    %3 = vector.load %arg3[%c0_3, %c0_4] : memref<1x128xf32, #tpu.memory_space<vmem>>, vector<1x128xf32>
    %4 = vector.broadcast %3 : vector<1x128xf32> to vector<104x128xf32>
    %5 = arith.addf %2, %4 : vector<104x128xf32>
    %cst_5 = arith.constant 0.000000e+00 : f32
    %6 = vector.broadcast %cst_5 : f32 to vector<104x128xf32>
    %7 = arith.maximumf %5, %6 : vector<104x128xf32>
    %c0_6 = arith.constant 0 : index
    %c0_7 = arith.constant 0 : index
    %8 = vector.load %arg4[%c0_6, %c0_7] : memref<128x128xf32, #tpu.memory_space<vmem>>, vector<128x128xf32>
    %cst_8 = arith.constant dense<0.000000e+00> : vector<104x128xf32>
    %9 = tpu.matmul %7, %8, %cst_8 {dimension_numbers = #tpu.dot_dimension_numbers<[1], [0], [0], [1], [0, 0, 1, 1], [], []>} : vector<104x128xf32>, vector<128x128xf32>, vector<104x128xf32> -> vector<104x128xf32>
    %c0_9 = arith.constant 0 : index
    %c0_10 = arith.constant 0 : index
    %10 = vector.load %arg5[%c0_9, %c0_10] : memref<1x128xf32, #tpu.memory_space<vmem>>, vector<1x128xf32>
    %11 = vector.broadcast %10 : vector<1x128xf32> to vector<104x128xf32>
    %12 = arith.addf %9, %11 : vector<104x128xf32>
    %cst_11 = arith.constant 0.000000e+00 : f32
    %13 = vector.broadcast %cst_11 : f32 to vector<104x128xf32>
    %14 = arith.maximumf %12, %13 : vector<104x128xf32>
    %c0_12 = arith.constant 0 : index
    %c0_13 = arith.constant 0 : index
    %15 = vector.load %arg6[%c0_12, %c0_13] : memref<128x10xf32, #tpu.memory_space<vmem>>, vector<128x10xf32>
    %cst_14 = arith.constant dense<0.000000e+00> : vector<104x10xf32>
    %16 = tpu.matmul %14, %15, %cst_14 {dimension_numbers = #tpu.dot_dimension_numbers<[1], [0], [0], [1], [0, 0, 1, 1], [], []>} : vector<104x128xf32>, vector<128x10xf32>, vector<104x10xf32> -> vector<104x10xf32>
    %c0_15 = arith.constant 0 : index
    %c0_16 = arith.constant 0 : index
    %17 = vector.load %arg7[%c0_15, %c0_16] : memref<1x10xf32, #tpu.memory_space<vmem>>, vector<1x10xf32>
    %18 = vector.broadcast %17 : vector<1x10xf32> to vector<104x10xf32>
    %19 = arith.addf %16, %18 : vector<104x10xf32>
    %c0_17 = arith.constant 0 : index
    %c0_18 = arith.constant 0 : index
    %20 = vector.load %arg8[%c0_17, %c0_18] : memref<104x10xf32, #tpu.memory_space<vmem>>, vector<104x10xf32>
    tpu.vector_store %arg8[%c0_17, %c0_18], %19 {strides = array<i32>} : memref<104x10xf32, #tpu.memory_space<vmem>>, vector<104x10xf32>,
    return
  }
  func.func @transform_0(%arg0: i32) -> (i32, i32) {
    %c0_i32 = arith.constant 0 : i32
    %c0_i32_0 = arith.constant 0 : i32
    return %arg0, %c0_i32 : i32, i32
  }
  func.func @transform_1(%arg0: i32) -> (i32, i32) {
    %c0_i32 = arith.constant 0 : i32
    %c0_i32_0 = arith.constant 0 : i32
    %c0_i32_1 = arith.constant 0 : i32
    return %c0_i32, %c0_i32_0 : i32, i32
  }
  func.func @transform_2(%arg0: i32) -> (i32, i32) {
    %c0_i32 = arith.constant 0 : i32
    %c0_i32_0 = arith.constant 0 : i32
    %c0_i32_1 = arith.constant 0 : i32
    return %c0_i32, %c0_i32_0 : i32, i32
  }
  func.func @transform_3(%arg0: i32) -> (i32, i32) {
    %c0_i32 = arith.constant 0 : i32
    %c0_i32_0 = arith.constant 0 : i32
    %c0_i32_1 = arith.constant 0 : i32
    return %c0_i32, %c0_i32_0 : i32, i32
  }
  func.func @transform_4(%arg0: i32) -> (i32, i32) {
    %c0_i32 = arith.constant 0 : i32
    %c0_i32_0 = arith.constant 0 : i32
    %c0_i32_1 = arith.constant 0 : i32
    return %c0_i32, %c0_i32_0 : i32, i32
  }
  func.func @transform_5(%arg0: i32) -> (i32, i32) {
    %c0_i32 = arith.constant 0 : i32
    %c0_i32_0 = arith.constant 0 : i32
    %c0_i32_1 = arith.constant 0 : i32
    return %c0_i32, %c0_i32_0 : i32, i32
  }
  func.func @transform_6(%arg0: i32) -> (i32, i32) {
    %c0_i32 = arith.constant 0 : i32
    %c0_i32_0 = arith.constant 0 : i32
    %c0_i32_1 = arith.constant 0 : i32
    return %c0_i32, %c0_i32_0 : i32, i32
  }
  func.func @transform_7(%arg0: i32) -> (i32, i32) {
    %c0_i32 = arith.constant 0 : i32
    %c0_i32_0 = arith.constant 0 : i32
    return %arg0, %c0_i32 : i32, i32
  }
}

</mosaic_0001>

<bundles_post_ra>
// kernel: tpu_custom_call.1
= control target key start
LH: loop header
LB: loop body
LE: loop exit
PB: predicated region body
PF: predicated region fallthrough
CT: control target
= control target key end

     0   :  { %12 = vsyncpa [#allocation3], 0  ;;  %s2260_s0 = inlined_call_operand.hbm [shape: f32[104,784], index: 0, kind: input, shape index: {}]   ;;  %s2261_s1 = inlined_call_operand.hbm [shape: f32[784,128], index: 1, kind: input, shape index: {}]   ;;  %s2262_s2 = inlined_call_operand.vmem [shape: f32[1,128], index: 2, kind: input, shape index: {}]   ;;  %s2263_s3 = inlined_call_operand.vmem [shape: f32[128,128], index: 3, kind: input, shape index: {}]   ;;  %s2264_s4 = inlined_call_operand.vmem [shape: f32[1,128], index: 4, kind: input, shape index: {}]   ;;  %s2265_s5 = inlined_call_operand.vmem [shape: f32[128,10], index: 5, kind: input, shape index: {}]   ;;  %s2266_s6 = inlined_call_operand.vmem [shape: f32[1,10], index: 6, kind: input, shape index: {}]   ;;  %s2267_s7 = inlined_call_operand.vmem [shape: f32[104,10], index: 7, kind: output, shape index: {}]  }
   0x1   :  { %13 = vsyncpa [#allocation5], 0  ;;  %s1853_s24 = smov [#allocation2]   ;;  %s1805_s28 = scalar_lea.hbm %s2260_s0, 11648 }
   0x2   :  { %s19_s25 = sshll.u32 %s1853_s24, 4  ;;  %p1806_p0 = scmp.ne.s32.totalorder %s2260_s0, %s1805_s28  ;;  %s20_s25 = int_to_ptr.vmem [resolvable:$true] %s19_s25 }
   0x3   :  { %p1809_p1 = scmp.lt.u32.totalorder %s1805_s28, %s2260_s0 }
   0x5   :  { %p1811_p2 = pnand %p1809_p1, %p1806_p0 }
   0x7   :  { %1814 = shalt.err (!%p1811_p2)
}
   0x8   :  { %s1815_s10 = scalar_lea.vmem %s20_s25, 11648  ;;  %p1820_p4 = scmp.lt.s32.totalorder %s20_s25, %s20_s25 }
   0x9   :  { %p1816_p3 = scmp.ne.s32.totalorder %s20_s25, %s1815_s10  ;;  %p1821_p5 = scmp.lt.s32.totalorder %s1815_s10, %s1815_s10 }
   0xb   :  { %p1822_p6 = por %p1821_p5, %p1820_p4 }
   0xd   :  { %p1823_p7 = pnand %p1822_p6, %p1816_p3 }
   0xf   :  { %1826 = shalt.err (!%p1823_p7)
}
  0x10   :  { %s1854_s11 = smov 896   ;;  %s1855_s12 = smov 56  }
  0x11   :  { %25 = dma.hbm_to_vmem [thread:$0]  %s2260_s0, 11648, %s20_s25, [#allocation3], %s1854_s11, %s1854_s11, %s1855_s12  }
  0x12   :  { %s1856_s15 = smov [#allocation4]   ;;  %s1827_s19 = scalar_lea.hbm %s2261_s1, 12544 }
  0x13   :  { %s31_s16 = sshll.u32 %s1856_s15, 4  ;;  %p1828_p8 = scmp.ne.s32.totalorder %s2261_s1, %s1827_s19  ;;  %s32_s16 = int_to_ptr.vmem [resolvable:$true] %s31_s16 }
  0x14   :  { %p1831_p9 = scmp.lt.u32.totalorder %s1827_s19, %s2261_s1 }
  0x16   :  { %p1833_p10 = pnand %p1831_p9, %p1828_p8 }
  0x18   :  { %1836 = shalt.err (!%p1833_p10)
}
  0x19   :  { %s1837_s24 = scalar_lea.vmem %s32_s16, 12544  ;;  %p1842_p12 = scmp.lt.s32.totalorder %s32_s16, %s32_s16 }
  0x1a   :  { %p1838_p11 = scmp.ne.s32.totalorder %s32_s16, %s1837_s24  ;;  %p1843_p13 = scmp.lt.s32.totalorder %s1837_s24, %s1837_s24 }
  0x1c   :  { %p1844_p0 = por %p1843_p13, %p1842_p12 }
  0x1e   :  { %p1845_p1 = pnand %p1844_p0, %p1838_p11 }
  0x20   :  { %1848 = shalt.err (!%p1845_p1)
}
  0x21   :  { %s1857_s0 = smov 128   ;;  %s1858_s25 = smov 8  }
  0x22   :  { %37 = dma.hbm_to_vmem [thread:$0]  %s2261_s1, 12544, %s32_s16, [#allocation5], %s1857_s0, %s1857_s0, %s1858_s25  }
  0x23   :  { %1849 = dma.done.wait [#allocation3], 11648  }
  0x24   :  { %1850 = vsyncadd [#allocation3], 4294955648 }
  0x25   :  { %1851 = dma.done.wait [#allocation5], 12544  }
  0x26   :  { %1852 = vsyncadd [#allocation5], 4294954752  ;;  %v161_v0 = vld [vmem:[#allocation4 + $0x80] sm:$0xff]  ;;  %v162_v1 = vld [vmem:[#allocation4 + $0x88] sm:$0xff]  ;;  %vm1860_vm0 = vmmov 0   ;;  %vm250_vm1 = vcmask 130048  }
  0x27   :  { %v145_v2 = vld [vmem:[#allocation4] sm:$0xff]  ;;  %v1649_v3 = vpack.c.bf16 %v162_v1, %v161_v0  ;;  %v146_v4 = vld [vmem:[#allocation4 + $0x8] sm:$0xff]  ;;  %v163_v11 = vld [vmem:[#allocation4 + $0x90] sm:$0xff]  ;;  %vm1142_vm2 = vcmask 80896  }
  0x28   :  { %v193_v5 = vld [vmem:[#allocation4 + $0x180] sm:$0xff]  ;;  %v194_v6 = vld [vmem:[#allocation4 + $0x188] sm:$0xff]  ;;  %v1651_v7 = vpack.c.bf16 %v146_v4, %v145_v2  ;;  %v164_v13 = vld [vmem:[#allocation4 + $0x98] sm:$0xff] }
  0x29   :  { %v1681_v8 = vpack.c.bf16 %v194_v6, %v193_v5  ;;  %v177_v9 = vld [vmem:[#allocation4 + $0x100] sm:$0xff]  ;;  %v178_v10 = vld [vmem:[#allocation4 + $0x108] sm:$0xff]  ;;  %1650 = vmatprep.subr.bf16.mxu0 %v1649_v3  ;;  %v147_v14 = vld [vmem:[#allocation4 + $0x10] sm:$0xff]  ;;  %v1653_v16 = vpack.c.bf16 %v164_v13, %v163_v11 }
  0x2a   :  { %v1683_v12 = vpack.c.bf16 %v178_v10, %v177_v9  ;;  %v148_v15 = vld [vmem:[#allocation4 + $0x18] sm:$0xff]  ;;  %1652 = vmatpush3.bf16.msra.mxu0 %v1651_v7  ;;  %v195_v18 = vld [vmem:[#allocation4 + $0x190] sm:$0xff]  ;;  %v165_v23 = vld [vmem:[#allocation4 + $0xa0] sm:$0xff] }
  0x2b   :  { %1682 = vmatprep.subr.bf16.mxu1 %v1681_v8  ;;  %v1655_v17 = vpack.c.bf16 %v148_v15, %v147_v14  ;;  %v196_v19 = vld [vmem:[#allocation4 + $0x198] sm:$0xff]  ;;  %v179_v20 = vld [vmem:[#allocation4 + $0x110] sm:$0xff]  ;;  %v166_v24 = vld [vmem:[#allocation4 + $0xa8] sm:$0xff]  ;;  %1654 = vmatprep.subr.bf16.mxu0 %v1653_v16 }
  0x2c   :  { %1684 = vmatpush3.bf16.msra.mxu1 %v1683_v12  ;;  %v1685_v21 = vpack.c.bf16 %v196_v19, %v195_v18  ;;  %v180_v22 = vld [vmem:[#allocation4 + $0x118] sm:$0xff]  ;;  %v1657_v26 = vpack.c.bf16 %v166_v24, %v165_v23  ;;  %v149_v27 = vld [vmem:[#allocation4 + $0x20] sm:$0xff]  ;;  %v150_v28 = vld [vmem:[#allocation4 + $0x28] sm:$0xff] }
  0x2d   :  { %v1687_v25 = vpack.c.bf16 %v180_v22, %v179_v20  ;;  %v197_v29 = vld [vmem:[#allocation4 + $0x1a0] sm:$0xff]  ;;  %v198_v30 = vld [vmem:[#allocation4 + $0x1a8] sm:$0xff]  ;;  %v1659_v33 = vpack.c.bf16 %v150_v28, %v149_v27  ;;  %v167_v35 = vld [vmem:[#allocation4 + $0xb0] sm:$0xff] }
  0x2e   :  { %1686 = vmatprep.subr.bf16.mxu1 %v1685_v21  ;;  %v181_v31 = vld [vmem:[#allocation4 + $0x120] sm:$0xff]  ;;  %v182_v32 = vld [vmem:[#allocation4 + $0x128] sm:$0xff]  ;;  %1656 = vmatpush3.bf16.msra.mxu0 %v1655_v17  ;;  %v1689_v34 = vpack.c.bf16 %v198_v30, %v197_v29  ;;  %v168_v36 = vld [vmem:[#allocation4 + $0xb8] sm:$0xff] }
  0x2f   :  { %v151_v37 = vld [vmem:[#allocation4 + $0x30] sm:$0xff]  ;;  %1658 = vmatprep.subr.bf16.mxu0 %v1657_v26  ;;  %v1691_v38 = vpack.c.bf16 %v182_v32, %v181_v31  ;;  %v1661_v39 = vpack.c.bf16 %v168_v36, %v167_v35  ;;  %v152_v40 = vld [vmem:[#allocation4 + $0x38] sm:$0xff]  ;;  %v169_v46 = vld [vmem:[#allocation4 + $0xc0] sm:$0xff] }
  0x30   :  { %1688 = vmatpush3.bf16.msra.mxu1 %v1687_v25  ;;  %v199_v41 = vld [vmem:[#allocation4 + $0x1b0] sm:$0xff]  ;;  %v200_v42 = vld [vmem:[#allocation4 + $0x1b8] sm:$0xff]  ;;  %v170_v47 = vld [vmem:[#allocation4 + $0xc8] sm:$0xff]  ;;  %v1663_v48 = vpack.c.bf16 %v152_v40, %v151_v37 }
  0x31   :  { %1690 = vmatprep.subr.bf16.mxu1 %v1689_v34  ;;  %v1693_v43 = vpack.c.bf16 %v200_v42, %v199_v41  ;;  %v183_v44 = vld [vmem:[#allocation4 + $0x130] sm:$0xff]  ;;  %v184_v45 = vld [vmem:[#allocation4 + $0x138] sm:$0xff]  ;;  %v201_v49 = vld [vmem:[#allocation4 + $0x1c0] sm:$0xff]  ;;  %v1665_v52 = vpack.c.bf16 %v170_v47, %v169_v46 }
  0x32   :  { %1660 = vmatpush3.bf16.msra.mxu0 %v1659_v33  ;;  %v202_v50 = vld [vmem:[#allocation4 + $0x1c8] sm:$0xff]  ;;  %v1695_v51 = vpack.c.bf16 %v184_v45, %v183_v44  ;;  %v153_v53 = vld [vmem:[#allocation4 + $0x40] sm:$0xff]  ;;  %v171_v58 = vld [vmem:[#allocation4 + $0xd0] sm:$0xff] }
  0x33   :  { %1662 = vmatprep.subr.bf16.mxu0 %v1661_v39  ;;  %v154_v54 = vld [vmem:[#allocation4 + $0x48] sm:$0xff]  ;;  %v185_v55 = vld [vmem:[#allocation4 + $0x140] sm:$0xff]  ;;  %v1697_v56 = vpack.c.bf16 %v202_v50, %v201_v49  ;;  %v172_v59 = vld [vmem:[#allocation4 + $0xd8] sm:$0xff] }
  0x34   :  { %1692 = vmatpush3.bf16.msra.mxu1 %v1691_v38  ;;  %v186_v57 = vld [vmem:[#allocation4 + $0x148] sm:$0xff]  ;;  %v203_v60 = vld [vmem:[#allocation4 + $0x1d0] sm:$0xff]  ;;  %v204_v61 = vld [vmem:[#allocation4 + $0x1d8] sm:$0xff]  ;;  %v1667_v62 = vpack.c.bf16 %v154_v54, %v153_v53  ;;  %v1669_v0 = vpack.c.bf16 %v172_v59, %v171_v58 }
  0x35   :  { %1694 = vmatprep.subr.bf16.mxu1 %v1693_v43  ;;  %v1699_v63 = vpack.c.bf16 %v186_v57, %v185_v55  ;;  %v155_v1 = vld [vmem:[#allocation4 + $0x50] sm:$0xff]  ;;  %v156_v2 = vld [vmem:[#allocation4 + $0x58] sm:$0xff]  ;;  %v1701_v4 = vpack.c.bf16 %v204_v61, %v203_v60  ;;  %v173_v6 = vld [vmem:[#allocation4 + $0xe0] sm:$0xff] }
  0x36   :  { %1664 = vmatpush3.bf16.msra.mxu0 %v1663_v48  ;;  %v187_v3 = vld [vmem:[#allocation4 + $0x150] sm:$0xff]  ;;  %v188_v5 = vld [vmem:[#allocation4 + $0x158] sm:$0xff]  ;;  %v174_v7 = vld [vmem:[#allocation4 + $0xe8] sm:$0xff]  ;;  %v1671_v10 = vpack.c.bf16 %v156_v2, %v155_v1  ;;  %v1859_v48 = vmov 0.0|0.0  }
  0x37   :  { %1666 = vmatprep.subr.bf16.mxu0 %v1665_v52  ;;  %v205_v8 = vld [vmem:[#allocation4 + $0x1e0] sm:$0xff]  ;;  %v206_v9 = vld [vmem:[#allocation4 + $0x1e8] sm:$0xff]  ;;  %v55_v12 = vld [vmem:[#allocation2 + $0x8] sm:$0xff]  ;;  %v1703_v13 = vpack.c.bf16 %v188_v5, %v187_v3  ;;  %v1673_v14 = vpack.c.bf16 %v174_v7, %v173_v6 }
  0x38   :  { %1696 = vmatpush3.bf16.msra.mxu1 %v1695_v51  ;;  %v157_v11 = vld [vmem:[#allocation4 + $0x60] sm:$0xff]  ;;  %v158_v15 = vld [vmem:[#allocation4 + $0x68] sm:$0xff]  ;;  %v1705_v18 = vpack.c.bf16 %v206_v9, %v205_v8  ;;  %v175_v19 = vld [vmem:[#allocation4 + $0xf0] sm:$0xff]  ;;  %354 = vmatprep.mubr.f32.mxu0 %v55_v12 }
  0x39   :  { %1698 = vmatprep.subr.bf16.mxu1 %v1697_v56  ;;  %v189_v16 = vld [vmem:[#allocation4 + $0x160] sm:$0xff]  ;;  %v190_v17 = vld [vmem:[#allocation4 + $0x168] sm:$0xff]  ;;  %v176_v20 = vld [vmem:[#allocation4 + $0xf8] sm:$0xff]  ;;  %v1675_v24 = vpack.c.bf16 %v158_v15, %v157_v11 }
  0x3a   :  { %1668 = vmatpush3.bf16.msra.mxu0 %v1667_v62  ;;  %v57_v21 = vld [vmem:[#allocation2 + $0x18] sm:$0xff]  ;;  %v207_v22 = vld [vmem:[#allocation4 + $0x1f0] sm:$0xff]  ;;  %v208_v23 = vld [vmem:[#allocation4 + $0x1f8] sm:$0xff]  ;;  %v1707_v25 = vpack.c.bf16 %v190_v17, %v189_v16  ;;  %v1677_v26 = vpack.c.bf16 %v176_v20, %v175_v19 }
  0x3b   :  { %1670 = vmatprep.subr.bf16.mxu0 %v1669_v0  ;;  %484 = vmatprep.mubr.f32.mxu1 %v57_v21  ;;  %v159_v27 = vld [vmem:[#allocation4 + $0x70] sm:$0xff]  ;;  %v160_v28 = vld [vmem:[#allocation4 + $0x78] sm:$0xff]  ;;  %v1709_v30 = vpack.c.bf16 %v208_v23, %v207_v22  ;;  %v225_v32 = vld [vmem:[#allocation4 + $0x280] sm:$0xff] }
  0x3c   :  { %1700 = vmatpush3.bf16.msra.mxu1 %v1699_v63  ;;  %v191_v29 = vld [vmem:[#allocation4 + $0x170] sm:$0xff]  ;;  %v192_v31 = vld [vmem:[#allocation4 + $0x178] sm:$0xff]  ;;  %v226_v33 = vld [vmem:[#allocation4 + $0x288] sm:$0xff]  ;;  %v1679_v34 = vpack.c.bf16 %v160_v28, %v159_v27 }
  0x3d   :  { %1702 = vmatprep.subr.bf16.mxu1 %v1701_v4  ;;  %v1711_v35 = vpack.c.bf16 %v192_v31, %v191_v29  ;;  %v1713_v36 = vpack.c.bf16 %v226_v33, %v225_v32  ;;  %v209_v37 = vld [vmem:[#allocation4 + $0x200] sm:$0xff]  ;;  %v210_v38 = vld [vmem:[#allocation4 + $0x208] sm:$0xff]  ;;  %v227_v41 = vld [vmem:[#allocation4 + $0x290] sm:$0xff] }
  0x3e   :  { %1672 = vmatpush3.bf16.msra.mxu0 %v1671_v10  ;;  %v241_v39 = vld [vmem:[#allocation4 + $0x300] sm:$0xff]  ;;  %v242_v40 = vld [vmem:[#allocation4 + $0x308] sm:$0xff]  ;;  %v228_v42 = vld [vmem:[#allocation4 + $0x298] sm:$0xff]  ;;  %v1715_v44 = vpack.c.bf16 %v210_v38, %v209_v37 }
  0x3f   :  { %1674 = vmatprep.subr.bf16.mxu0 %v1673_v14  ;;  %v54_v43 = vld [vmem:[#allocation2] sm:$0xff]  ;;  %v56_v45 = vld [vmem:[#allocation2 + $0x10] sm:$0xff]  ;;  %v1746_v49 = vpack.c.bf16 %v242_v40, %v241_v39  ;;  %v1717_v50 = vpack.c.bf16 %v228_v42, %v227_v41  ;;  %v211_v51 = vld [vmem:[#allocation4 + $0x210] sm:$0xff] }
  0x40   :  { %1704 = vmatpush3.bf16.msra.mxu1 %v1703_v13  ;;  %v62_v46 = vld [vmem:[#allocation2 + $0x40] sm:$0xff]  ;;  %v64_v47 = vld [vmem:[#allocation2 + $0x50] sm:$0xff]  ;;  %v229_v53 = vld [vmem:[#allocation4 + $0x2a0] sm:$0xff] }
  0x41   :  { %1706 = vmatprep.subr.bf16.mxu1 %v1705_v18  ;;  %v212_v52 = vld [vmem:[#allocation4 + $0x218] sm:$0xff]  ;;  %v230_v54 = vld [vmem:[#allocation4 + $0x2a8] sm:$0xff]  ;;  %v61_v55 = vld [vmem:[#allocation2 + $0x38] sm:$0xff] }
  0x42   :  { %1676 = vmatpush3.bf16.msra.mxu0 %v1675_v24  ;;  %v63_v56 = vld [vmem:[#allocation2 + $0x48] sm:$0xff]  ;;  %v69_v57 = vld [vmem:[#allocation2 + $0x78] sm:$0xff]  ;;  %v1719_v58 = vpack.c.bf16 %v212_v52, %v211_v51  ;;  %v1721_v60 = vpack.c.bf16 %v230_v54, %v229_v53  ;;  %v214_v62 = vld [vmem:[#allocation4 + $0x228] sm:$0xff] }
  0x43   :  { %1678 = vmatprep.subr.bf16.mxu0 %v1677_v26  ;;  %v71_v59 = vld [vmem:[#allocation2 + $0x88] sm:$0xff]  ;;  %v213_v61 = vld [vmem:[#allocation4 + $0x220] sm:$0xff]  ;;  %v232_v0 = vld [vmem:[#allocation4 + $0x2b8] sm:$0xff] }
  0x44   :  { %1708 = vmatpush3.bf16.msra.mxu1 %v1707_v25  ;;  %v231_v63 = vld [vmem:[#allocation4 + $0x2b0] sm:$0xff]  ;;  %v68_v1 = vld [vmem:[#allocation2 + $0x70] sm:$0xff]  ;;  %v70_v2 = vld [vmem:[#allocation2 + $0x80] sm:$0xff]  ;;  %v1723_v4 = vpack.c.bf16 %v214_v62, %v213_v61 }
  0x45   :  { %1710 = vmatprep.subr.bf16.mxu1 %v1709_v30  ;;  %v76_v3 = vld [vmem:[#allocation2 + $0xb0] sm:$0xff]  ;;  %v78_v5 = vld [vmem:[#allocation2 + $0xc0] sm:$0xff]  ;;  %v1725_v6 = vpack.c.bf16 %v232_v0, %v231_v63  ;;  %v215_v7 = vld [vmem:[#allocation4 + $0x230] sm:$0xff] }
  0x46   :  { %1680 = vmatpush3.bf16.msra.mxu0 %v1679_v34  ;;  %v216_v8 = vld [vmem:[#allocation4 + $0x238] sm:$0xff]  ;;  %v233_v9 = vld [vmem:[#allocation4 + $0x2c0] sm:$0xff]  ;;  %v234_v10 = vld [vmem:[#allocation4 + $0x2c8] sm:$0xff] }
  0x47   :  { %1714 = vmatprep.subr.bf16.mxu0 %v1713_v36  ;;  %v75_v11 = vld [vmem:[#allocation2 + $0xa8] sm:$0xff]  ;;  %v77_v12 = vld [vmem:[#allocation2 + $0xb8] sm:$0xff]  ;;  %v1727_v14 = vpack.c.bf16 %v216_v8, %v215_v7  ;;  %v1729_v16 = vpack.c.bf16 %v234_v10, %v233_v9  ;;  %v218_v18 = vld [vmem:[#allocation4 + $0x248] sm:$0xff] }
  0x48   :  { %1712 = vmatpush3.bf16.msra.mxu1 %v1711_v35  ;;  %v83_v13 = vld [vmem:[#allocation2 + $0xe8] sm:$0xff]  ;;  %v85_v15 = vld [vmem:[#allocation2 + $0xf8] sm:$0xff]  ;;  %v236_v20 = vld [vmem:[#allocation4 + $0x2d8] sm:$0xff] }
  0x49   :  { %1745 = vmatprep.subr.bf16.mxu1 %v1859_v48  ;;  %355 = vmatmul.mubr.f32.vlgmr.msra.gmra.mrb[0].mxu0 %v54_v43  ;;  %v217_v17 = vld [vmem:[#allocation4 + $0x240] sm:$0xff]  ;;  %v235_v19 = vld [vmem:[#allocation4 + $0x2d0] sm:$0xff]  ;;  %v82_v21 = vld [vmem:[#allocation2 + $0xe0] sm:$0xff] }
  0x4a   :  { %1716 = vmatpush3.bf16.msra.mxu0 %v1715_v44  ;;  %359 = vmatprep.mubr.f32.mxu0 %v62_v46  ;;  %v84_v22 = vld [vmem:[#allocation2 + $0xf0] sm:$0xff]  ;;  %v90_v23 = vld [vmem:[#allocation2 + $0x120] sm:$0xff]  ;;  %v1731_v24 = vpack.c.bf16 %v218_v18, %v217_v17  ;;  %v1733_v26 = vpack.c.bf16 %v236_v20, %v235_v19  ;;  %v219_v27 = vld [vmem:[#allocation4 + $0x250] sm:$0xff] }
  0x4b   :  { %485 = vmatmul.mubr.f32.vlgmr.msra.gmra.mrb[0].mxu1 %v56_v45  ;;  %1718 = vmatprep.subr.bf16.mxu0 %v1717_v50  ;;  %v92_v25 = vld [vmem:[#allocation2 + $0x130] sm:$0xff]  ;;  %v237_v29 = vld [vmem:[#allocation4 + $0x2e0] sm:$0xff]  ;;  %v238_v30 = vld [vmem:[#allocation4 + $0x2e8] sm:$0xff] }
  0x4c   :  { %489 = vmatprep.mubr.f32.mxu1 %v64_v47  ;;  %1747 = vmatpush3.bf16.msra.mxu1 %v1746_v49  ;;  %v220_v28 = vld [vmem:[#allocation4 + $0x258] sm:$0xff]  ;;  %v89_v31 = vld [vmem:[#allocation2 + $0x118] sm:$0xff]  ;;  %v91_v32 = vld [vmem:[#allocation2 + $0x128] sm:$0xff]  ;;  %v1737_v36 = vpack.c.bf16 %v238_v30, %v237_v29 }
  0x4d   :  { %360 = vmatmul.mubr.f32.gmra.mrb[2].mxu0 %v61_v55  ;;  %1772 = vmatprep.subr.bf16.mxu1 %v1859_v48  ;;  %v97_v33 = vld [vmem:[#allocation2 + $0x158] sm:$0xff]  ;;  %v1735_v34 = vpack.c.bf16 %v220_v28, %v219_v27  ;;  %v99_v35 = vld [vmem:[#allocation2 + $0x168] sm:$0xff]  ;;  %v222_v38 = vld [vmem:[#allocation4 + $0x268] sm:$0xff] }
  0x4e   :  { %364 = vmatprep.mubr.f32.mxu0 %v69_v57  ;;  %1720 = vmatpush3.bf16.msra.mxu0 %v1719_v58  ;;  %v221_v37 = vld [vmem:[#allocation4 + $0x260] sm:$0xff]  ;;  %v239_v39 = vld [vmem:[#allocation4 + $0x2f0] sm:$0xff]  ;;  %v240_v40 = vld [vmem:[#allocation4 + $0x2f8] sm:$0xff] }
  0x4f   :  { %490 = vmatmul.mubr.f32.gmra.mrb[2].mxu1 %v63_v56  ;;  %1722 = vmatprep.subr.bf16.mxu0 %v1721_v60  ;;  %v96_v41 = vld [vmem:[#allocation2 + $0x150] sm:$0xff]  ;;  %v98_v42 = vld [vmem:[#allocation2 + $0x160] sm:$0xff]  ;;  %v1739_v44 = vpack.c.bf16 %v222_v38, %v221_v37  ;;  %v1741_v46 = vpack.c.bf16 %v240_v40, %v239_v39  ;;  %v223_v47 = vld [vmem:[#allocation4 + $0x270] sm:$0xff] }
  0x50   :  { %494 = vmatprep.mubr.f32.mxu1 %v71_v59  ;;  %v104_v43 = vld [vmem:[#allocation2 + $0x190] sm:$0xff]  ;;  %v106_v45 = vld [vmem:[#allocation2 + $0x1a0] sm:$0xff]  ;;  %v103_v50 = vld [vmem:[#allocation2 + $0x188] sm:$0xff] }
  0x51   :  { %365 = vmatmul.mubr.f32.gmra.mrb[4].mxu0 %v68_v1  ;;  %v224_v49 = vld [vmem:[#allocation4 + $0x278] sm:$0xff]  ;;  %v105_v51 = vld [vmem:[#allocation2 + $0x198] sm:$0xff]  ;;  %v111_v52 = vld [vmem:[#allocation2 + $0x1c8] sm:$0xff] }
  0x52   :  { %369 = vmatprep.mubr.f32.mxu0 %v76_v3  ;;  %1724 = vmatpush3.bf16.msra.mxu0 %v1723_v4  ;;  %v1743_v53 = vpack.c.bf16 %v224_v49, %v223_v47  ;;  %v113_v54 = vld [vmem:[#allocation2 + $0x1d8] sm:$0xff]  ;;  %v110_v55 = vld [vmem:[#allocation2 + $0x1c0] sm:$0xff]  ;;  %v112_v56 = vld [vmem:[#allocation2 + $0x1d0] sm:$0xff] }
  0x53   :  { %495 = vmatmul.mubr.f32.gmra.mrb[4].mxu1 %v70_v2  ;;  %1726 = vmatprep.subr.bf16.mxu0 %v1725_v6  ;;  %v118_v57 = vld [vmem:[#allocation2 + $0x200] sm:$0xff]  ;;  %v120_v58 = vld [vmem:[#allocation2 + $0x210] sm:$0xff]  ;;  %v117_v59 = vld [vmem:[#allocation2 + $0x1f8] sm:$0xff] }
  0x54   :  { %499 = vmatprep.mubr.f32.mxu1 %v78_v5  ;;  %v119_v60 = vld [vmem:[#allocation2 + $0x208] sm:$0xff]  ;;  %v125_v61 = vld [vmem:[#allocation2 + $0x238] sm:$0xff]  ;;  %v124_v63 = vld [vmem:[#allocation2 + $0x230] sm:$0xff] }
  0x55   :  { %370 = vmatmul.mubr.f32.gmra.mrb[6].mxu0 %v75_v11  ;;  %v127_v62 = vld [vmem:[#allocation2 + $0x248] sm:$0xff]  ;;  %v126_v0 = vld [vmem:[#allocation2 + $0x240] sm:$0xff]  ;;  %v132_v1 = vld [vmem:[#allocation2 + $0x270] sm:$0xff] }
  0x56   :  { %374 = vmatprep.mubr.f32.mxu0 %v83_v13  ;;  %1728 = vmatpush3.bf16.msra.mxu0 %v1727_v14  ;;  %v134_v2 = vld [vmem:[#allocation2 + $0x280] sm:$0xff]  ;;  %v131_v3 = vld [vmem:[#allocation2 + $0x268] sm:$0xff]  ;;  %v133_v4 = vld [vmem:[#allocation2 + $0x278] sm:$0xff] }
  0x57   :  { %500 = vmatmul.mubr.f32.gmra.mrb[6].mxu1 %v77_v12  ;;  %1730 = vmatprep.subr.bf16.mxu0 %v1729_v16  ;;  %v139_v5 = vld [vmem:[#allocation2 + $0x2a8] sm:$0xff]  ;;  %v141_v6 = vld [vmem:[#allocation2 + $0x2b8] sm:$0xff]  ;;  %v138_v7 = vld [vmem:[#allocation2 + $0x2a0] sm:$0xff]  ;;  %v1861_v12 = vmov 0.0  }
  0x58   :  { %504 = vmatprep.mubr.f32.mxu1 %v85_v15  ;;  %v140_v8 = vld [vmem:[#allocation2 + $0x2b0] sm:$0xff]  ;;  %v59_v9 = vld [vmem:[#allocation2 + $0x28] sm:$0xff]  ;;  %v58_v10 = vld [vmem:[#allocation2 + $0x20] sm:$0xff] }
  0x59   :  { %375 = vmatmul.mubr.f32.gmra.mrb[8].mxu0 %v82_v21  ;;  %v66_v11 = vld [vmem:[#allocation2 + $0x60] sm:$0xff]  ;;  %v60_v13 = vld [vmem:[#allocation2 + $0x30] sm:$0xff]  ;;  %v65_v14 = vld [vmem:[#allocation2 + $0x58] sm:$0xff] }
  0x5a   :  { %379 = vmatprep.mubr.f32.mxu0 %v90_v23  ;;  %1732 = vmatpush3.bf16.msra.mxu0 %v1731_v24  ;;  %v73_v15 = vld [vmem:[#allocation2 + $0x98] sm:$0xff]  ;;  %v67_v16 = vld [vmem:[#allocation2 + $0x68] sm:$0xff]  ;;  %v72_v17 = vld [vmem:[#allocation2 + $0x90] sm:$0xff] }
  0x5b   :  { %505 = vmatmul.mubr.f32.gmra.mrb[8].mxu1 %v84_v22  ;;  %1734 = vmatprep.subr.bf16.mxu0 %v1733_v26  ;;  %v80_v18 = vld [vmem:[#allocation2 + $0xd0] sm:$0xff]  ;;  %v74_v19 = vld [vmem:[#allocation2 + $0xa0] sm:$0xff]  ;;  %v79_v20 = vld [vmem:[#allocation2 + $0xc8] sm:$0xff] }
  0x5c   :  { %509 = vmatprep.mubr.f32.mxu1 %v92_v25  ;;  %v87_v21 = vld [vmem:[#allocation2 + $0x108] sm:$0xff]  ;;  %v81_v22 = vld [vmem:[#allocation2 + $0xd8] sm:$0xff]  ;;  %v86_v23 = vld [vmem:[#allocation2 + $0x100] sm:$0xff] }
  0x5d   :  { %380 = vmatmul.mubr.f32.gmra.mrb[10].mxu0 %v89_v31  ;;  %v94_v24 = vld [vmem:[#allocation2 + $0x140] sm:$0xff]  ;;  %v88_v25 = vld [vmem:[#allocation2 + $0x110] sm:$0xff]  ;;  %v93_v26 = vld [vmem:[#allocation2 + $0x138] sm:$0xff] }
  0x5e   :  { %384 = vmatprep.mubr.f32.mxu0 %v97_v33  ;;  %1736 = vmatpush3.bf16.msra.mxu0 %v1735_v34  ;;  %v101_v27 = vld [vmem:[#allocation2 + $0x178] sm:$0xff]  ;;  %v95_v28 = vld [vmem:[#allocation2 + $0x148] sm:$0xff]  ;;  %v100_v29 = vld [vmem:[#allocation2 + $0x170] sm:$0xff] }
  0x5f   :  { %510 = vmatmul.mubr.f32.gmra.mrb[10].mxu1 %v91_v32  ;;  %1738 = vmatprep.subr.bf16.mxu0 %v1737_v36  ;;  %v108_v30 = vld [vmem:[#allocation2 + $0x1b0] sm:$0xff]  ;;  %v102_v31 = vld [vmem:[#allocation2 + $0x180] sm:$0xff]  ;;  %v107_v32 = vld [vmem:[#allocation2 + $0x1a8] sm:$0xff] }
  0x60   :  { %514 = vmatprep.mubr.f32.mxu1 %v99_v35  ;;  %v115_v33 = vld [vmem:[#allocation2 + $0x1e8] sm:$0xff]  ;;  %v109_v34 = vld [vmem:[#allocation2 + $0x1b8] sm:$0xff]  ;;  %v114_v35 = vld [vmem:[#allocation2 + $0x1e0] sm:$0xff] }
  0x61   :  { %385 = vmatmul.mubr.f32.gmra.mrb[12].mxu0 %v96_v41  ;;  %v122_v36 = vld [vmem:[#allocation2 + $0x220] sm:$0xff]  ;;  %v116_v37 = vld [vmem:[#allocation2 + $0x1f0] sm:$0xff]  ;;  %v121_v38 = vld [vmem:[#allocation2 + $0x218] sm:$0xff] }
  0x62   :  { %389 = vmatprep.mubr.f32.mxu0 %v104_v43  ;;  %1740 = vmatpush3.bf16.msra.mxu0 %v1739_v44  ;;  %v129_v39 = vld [vmem:[#allocation2 + $0x258] sm:$0xff]  ;;  %v123_v40 = vld [vmem:[#allocation2 + $0x228] sm:$0xff]  ;;  %v128_v41 = vld [vmem:[#allocation2 + $0x250] sm:$0xff] }
  0x63   :  { %515 = vmatmul.mubr.f32.gmra.mrb[12].mxu1 %v98_v42  ;;  %1742 = vmatprep.subr.bf16.mxu0 %v1741_v46  ;;  %v136_v42 = vld [vmem:[#allocation2 + $0x290] sm:$0xff]  ;;  %v130_v43 = vld [vmem:[#allocation2 + $0x260] sm:$0xff]  ;;  %v135_v44 = vld [vmem:[#allocation2 + $0x288] sm:$0xff] }
  0x64   :  { %519 = vmatprep.mubr.f32.mxu1 %v106_v45  ;;  %v143_v45 = vld [vmem:[#allocation2 + $0x2c8] sm:$0xff]  ;;  %v137_v46 = vld [vmem:[#allocation2 + $0x298] sm:$0xff]  ;;  %v142_v47 = vld [vmem:[#allocation2 + $0x2c0] sm:$0xff] }
  0x65   :  { %390 = vmatmul.mubr.f32.gmra.mrb[14].mxu0 %v103_v50  ;;  %v823_v49 = vld [vmem:[%s2263_s3] sm:$0xff]  ;;  %v824_v50 = vld [vmem:[%s2263_s3 + $0x8] sm:$0xff] }
  0x66   :  { %394 = vmatprep.mubr.f32.mxu0 %v111_v52  ;;  %1744 = vmatpush3.bf16.msra.mxu0 %v1743_v53  ;;  %v1749_v52 = vpack.c.bf16 %v824_v50, %v823_v49  ;;  %v825_v53 = vld [vmem:[%s2263_s3 + $0x10] sm:$0xff] }
  0x67   :  { %520 = vmatmul.mubr.f32.gmra.mrb[14].mxu1 %v105_v51  ;;  %1748 = vmatprep.subr.bf16.mxu0 %v1859_v48  ;;  %v144_v51 = vld [vmem:[#allocation2 + $0x2d0] sm:$0xff] }
  0x68   :  { %524 = vmatprep.mubr.f32.mxu1 %v113_v54  ;;  %v826_v54 = vld [vmem:[%s2263_s3 + $0x18] sm:$0xff] }
  0x69   :  { %395 = vmatmul.mubr.f32.gmra.mrb[16].mxu0 %v110_v55  ;;  %v1752_v55 = vpack.c.bf16 %v826_v54, %v825_v53 }
  0x6a   :  { %399 = vmatprep.mubr.f32.mxu0 %v118_v57  ;;  %v828_v57 = vld [vmem:[%s2263_s3 + $0x28] sm:$0xff] }
  0x6b   :  { %525 = vmatmul.mubr.f32.gmra.mrb[16].mxu1 %v112_v56  ;;  %v827_v56 = vld [vmem:[%s2263_s3 + $0x20] sm:$0xff] }
  0x6c   :  { %529 = vmatprep.mubr.f32.mxu1 %v120_v58  ;;  %v1755_v58 = vpack.c.bf16 %v828_v57, %v827_v56 }
  0x6d   :  { %400 = vmatmul.mubr.f32.gmra.mrb[18].mxu0 %v117_v59  ;;  %v829_v59 = vld [vmem:[%s2263_s3 + $0x30] sm:$0xff] }
  0x6e   :  { %404 = vmatprep.mubr.f32.mxu0 %v125_v61 }
  0x6f   :  { %530 = vmatmul.mubr.f32.gmra.mrb[18].mxu1 %v119_v60  ;;  %v830_v60 = vld [vmem:[%s2263_s3 + $0x38] sm:$0xff] }
  0x70   :  { %534 = vmatprep.mubr.f32.mxu1 %v127_v62  ;;  %v1758_v61 = vpack.c.bf16 %v830_v60, %v829_v59  ;;  %v831_v62 = vld [vmem:[%s2263_s3 + $0x40] sm:$0xff] }
  0x71   :  { %405 = vmatmul.mubr.f32.gmra.mrb[20].mxu0 %v124_v63  ;;  %v832_v63 = vld [vmem:[%s2263_s3 + $0x48] sm:$0xff] }
  0x72   :  { %409 = vmatprep.mubr.f32.mxu0 %v132_v1  ;;  %v833_v1 = vld [vmem:[%s2263_s3 + $0x50] sm:$0xff] }
  0x73   :  { %535 = vmatmul.mubr.f32.gmra.mrb[20].mxu1 %v126_v0  ;;  %v1761_v0 = vpack.c.bf16 %v832_v63, %v831_v62 }
  0x74   :  { %539 = vmatprep.mubr.f32.mxu1 %v134_v2  ;;  %v834_v2 = vld [vmem:[%s2263_s3 + $0x58] sm:$0xff] }
  0x75   :  { %410 = vmatmul.mubr.f32.gmra.mrb[22].mxu0 %v131_v3  ;;  %v1764_v3 = vpack.c.bf16 %v834_v2, %v833_v1 }
  0x76   :  { %414 = vmatprep.mubr.f32.mxu0 %v139_v5  ;;  %v836_v5 = vld [vmem:[%s2263_s3 + $0x68] sm:$0xff] }
  0x77   :  { %540 = vmatmul.mubr.f32.gmra.mrb[22].mxu1 %v133_v4  ;;  %v835_v4 = vld [vmem:[%s2263_s3 + $0x60] sm:$0xff] }
  0x78   :  { %544 = vmatprep.mubr.f32.mxu1 %v141_v6  ;;  %v1767_v6 = vpack.c.bf16 %v836_v5, %v835_v4 }
  0x79   :  { %415 = vmatmul.mubr.f32.gmra.mrb[24].mxu0 %v138_v7  ;;  %v837_v7 = vld [vmem:[%s2263_s3 + $0x70] sm:$0xff] }
  0x7a   :  { %614 = vmatprep.mubr.f32.mxu0 %v59_v9 }
  0x7b   :  { %545 = vmatmul.mubr.f32.gmra.mrb[24].mxu1 %v140_v8  ;;  %v838_v8 = vld [vmem:[%s2263_s3 + $0x78] sm:$0xff] }
  0x7c   :  { %1468 = vmatprep.mubr.msk.f32.mxu1 %vm1860_vm0, %v1861_v12  ;;  %v1770_v9 = vpack.c.bf16 %v838_v8, %v837_v7 }
  0x7d   :  { %615 = vmatmul.mubr.f32.vlgmr.msra.gmra.mrb[26].mxu0 %v58_v10  ;;  %v989_v10 = vld [vmem:[%s2265_s5] sm:$0xff] }
  0x7e   :  { %619 = vmatprep.mubr.f32.mxu0 %v66_v11  ;;  %1750 = vmatpush3.bf16.msra.mxu0 %v1749_v52  ;;  %v990_v11 = vld [vmem:[%s2265_s5 + $0x8] sm:$0xff] }
  0x7f   :  { %1469 = vmatmul.mubr.msk.f32.vlgmr.msra.gmra.mrb[26].mxu1 %vm250_vm1, %v60_v13  ;;  %1751 = vmatprep.subr.bf16.mxu0 %v1859_v48  ;;  %v991_v13 = vld [vmem:[%s2265_s5 + $0x10] sm:$0xff] }
  0x80   :  { %1471 = vmatprep.mubr.msk.f32.mxu1 %vm1860_vm0, %v1861_v12 }
  0x81   :  { %620 = vmatmul.mubr.f32.gmra.mrb[28].mxu0 %v65_v14  ;;  %v1773_v14 = vpack.c.bf16 %v990_v11, %v989_v10 }
  0x82   :  { %624 = vmatprep.mubr.f32.mxu0 %v73_v15  ;;  %1753 = vmatpush3.bf16.msra.mxu0 %v1752_v55  ;;  %v992_v15 = vld [vmem:[%s2265_s5 + $0x18] sm:$0xff] }
  0x83   :  { %1472 = vmatmul.mubr.msk.f32.gmra.mrb[28].mxu1 %vm250_vm1, %v67_v16  ;;  %1754 = vmatprep.subr.bf16.mxu0 %v1859_v48  ;;  %v1776_v16 = vpack.c.bf16 %v992_v15, %v991_v13 }
  0x84   :  { %1474 = vmatprep.mubr.msk.f32.mxu1 %vm1860_vm0, %v1861_v12  ;;  %1774 = vmatpush3.bf16.msra.mxu1 %v1773_v14 }
  0x85   :  { %625 = vmatmul.mubr.f32.gmra.mrb[30].mxu0 %v72_v17  ;;  %1775 = vmatprep.subr.bf16.mxu1 %v1859_v48  ;;  %v993_v17 = vld [vmem:[%s2265_s5 + $0x20] sm:$0xff] }
  0x86   :  { %629 = vmatprep.mubr.f32.mxu0 %v80_v18  ;;  %1756 = vmatpush3.bf16.msra.mxu0 %v1755_v58  ;;  %v994_v18 = vld [vmem:[%s2265_s5 + $0x28] sm:$0xff] }
  0x87   :  { %1475 = vmatmul.mubr.msk.f32.gmra.mrb[30].mxu1 %vm250_vm1, %v74_v19  ;;  %1757 = vmatprep.subr.bf16.mxu0 %v1859_v48  ;;  %v1779_v19 = vpack.c.bf16 %v994_v18, %v993_v17 }
  0x88   :  { %1477 = vmatprep.mubr.msk.f32.mxu1 %vm1860_vm0, %v1861_v12  ;;  %1777 = vmatpush3.bf16.msra.mxu1 %v1776_v16 }
  0x89   :  { %630 = vmatmul.mubr.f32.gmra.mrb[32].mxu0 %v79_v20  ;;  %1778 = vmatprep.subr.bf16.mxu1 %v1859_v48  ;;  %v995_v20 = vld [vmem:[%s2265_s5 + $0x30] sm:$0xff] }
  0x8a   :  { %634 = vmatprep.mubr.f32.mxu0 %v87_v21  ;;  %1759 = vmatpush3.bf16.msra.mxu0 %v1758_v61  ;;  %v996_v21 = vld [vmem:[%s2265_s5 + $0x38] sm:$0xff] }
  0x8b   :  { %1478 = vmatmul.mubr.msk.f32.gmra.mrb[32].mxu1 %vm250_vm1, %v81_v22  ;;  %1760 = vmatprep.subr.bf16.mxu0 %v1859_v48  ;;  %v1782_v22 = vpack.c.bf16 %v996_v21, %v995_v20 }
  0x8c   :  { %1480 = vmatprep.mubr.msk.f32.mxu1 %vm1860_vm0, %v1861_v12  ;;  %1780 = vmatpush3.bf16.msra.mxu1 %v1779_v19 }
  0x8d   :  { %635 = vmatmul.mubr.f32.gmra.mrb[34].mxu0 %v86_v23  ;;  %1781 = vmatprep.subr.bf16.mxu1 %v1859_v48  ;;  %v997_v23 = vld [vmem:[%s2265_s5 + $0x40] sm:$0xff] }
  0x8e   :  { %639 = vmatprep.mubr.f32.mxu0 %v94_v24  ;;  %1762 = vmatpush3.bf16.msra.mxu0 %v1761_v0  ;;  %v998_v24 = vld [vmem:[%s2265_s5 + $0x48] sm:$0xff] }
  0x8f   :  { %1481 = vmatmul.mubr.msk.f32.gmra.mrb[34].mxu1 %vm250_vm1, %v88_v25  ;;  %1763 = vmatprep.subr.bf16.mxu0 %v1859_v48  ;;  %v1785_v25 = vpack.c.bf16 %v998_v24, %v997_v23 }
  0x90   :  { %1483 = vmatprep.mubr.msk.f32.mxu1 %vm1860_vm0, %v1861_v12  ;;  %1783 = vmatpush3.bf16.msra.mxu1 %v1782_v22 }
  0x91   :  { %640 = vmatmul.mubr.f32.gmra.mrb[36].mxu0 %v93_v26  ;;  %1784 = vmatprep.subr.bf16.mxu1 %v1859_v48  ;;  %v999_v26 = vld [vmem:[%s2265_s5 + $0x50] sm:$0xff] }
  0x92   :  { %644 = vmatprep.mubr.f32.mxu0 %v101_v27  ;;  %1765 = vmatpush3.bf16.msra.mxu0 %v1764_v3  ;;  %v1000_v27 = vld [vmem:[%s2265_s5 + $0x58] sm:$0xff] }
  0x93   :  { %1484 = vmatmul.mubr.msk.f32.gmra.mrb[36].mxu1 %vm250_vm1, %v95_v28  ;;  %1766 = vmatprep.subr.bf16.mxu0 %v1859_v48 }
  0x94   :  { %1486 = vmatprep.mubr.msk.f32.mxu1 %vm1860_vm0, %v1861_v12  ;;  %1786 = vmatpush3.bf16.msra.mxu1 %v1785_v25 }
  0x95   :  { %645 = vmatmul.mubr.f32.gmra.mrb[38].mxu0 %v100_v29  ;;  %v2070_v29 = vld [vmem:[%s2262_s2] ss:$0 sm:$0xff]  ;;  %1787 = vmatprep.subr.bf16.mxu1 %v1859_v48 }
  0x96   :  { %649 = vmatprep.mubr.f32.mxu0 %v108_v30  ;;  %1768 = vmatpush3.bf16.msra.mxu0 %v1767_v6 }
  0x97   :  { %1487 = vmatmul.mubr.msk.f32.gmra.mrb[38].mxu1 %vm250_vm1, %v102_v31  ;;  %1769 = vmatprep.subr.bf16.mxu0 %v1859_v48 }
  0x98   :  { %1489 = vmatprep.mubr.msk.f32.mxu1 %vm1860_vm0, %v1861_v12 }
  0x99   :  { %650 = vmatmul.mubr.f32.gmra.mrb[40].mxu0 %v107_v32  ;;  %v1788_v32 = vpack.c.bf16 %v1000_v27, %v999_v26 }
  0x9a   :  { %654 = vmatprep.mubr.f32.mxu0 %v115_v33  ;;  %1771 = vmatpush3.bf16.msra.mxu0 %v1770_v9 }
  0x9b   :  { %1490 = vmatmul.mubr.msk.f32.gmra.mrb[40].mxu1 %vm250_vm1, %v109_v34 }
  0x9c   :  { %1492 = vmatprep.mubr.msk.f32.mxu1 %vm1860_vm0, %v1861_v12  ;;  %1789 = vmatpush3.bf16.msra.mxu1 %v1788_v32 }
  0x9d   :  { %655 = vmatmul.mubr.f32.gmra.mrb[42].mxu0 %v114_v35  ;;  %v1001_v35 = vld [vmem:[%s2265_s5 + $0x60] sm:$0xff]  ;;  %1790 = vmatprep.subr.bf16.mxu1 %v1859_v48 }
  0x9e   :  { %659 = vmatprep.mubr.f32.mxu0 %v122_v36  ;;  %v1002_v36 = vld [vmem:[%s2265_s5 + $0x68] sm:$0xff] }
  0x9f   :  { %1493 = vmatmul.mubr.msk.f32.gmra.mrb[42].mxu1 %vm250_vm1, %v116_v37 }
  0xa0   :  { %1495 = vmatprep.mubr.msk.f32.mxu1 %vm1860_vm0, %v1861_v12 }
  0xa1   :  { %660 = vmatmul.mubr.f32.gmra.mrb[44].mxu0 %v121_v38 }
  0xa2   :  { %664 = vmatprep.mubr.f32.mxu0 %v129_v39 }
  0xa3   :  { %1496 = vmatmul.mubr.msk.f32.gmra.mrb[44].mxu1 %vm250_vm1, %v123_v40 }
  0xa4   :  { %1498 = vmatprep.mubr.msk.f32.mxu1 %vm1860_vm0, %v1861_v12 }
  0xa5   :  { %665 = vmatmul.mubr.f32.gmra.mrb[46].mxu0 %v128_v41 }
  0xa6   :  { %669 = vmatprep.mubr.f32.mxu0 %v136_v42  ;;  %v1791_v42 = vpack.c.bf16 %v1002_v36, %v1001_v35 }
  0xa7   :  { %1499 = vmatmul.mubr.msk.f32.gmra.mrb[46].mxu1 %vm250_vm1, %v130_v43 }
  0xa8   :  { %1501 = vmatprep.mubr.msk.f32.mxu1 %vm1860_vm0, %v1861_v12  ;;  %1792 = vmatpush3.bf16.msra.mxu1 %v1791_v42 }
  0xa9   :  { %670 = vmatmul.mubr.f32.gmra.mrb[48].mxu0 %v135_v44  ;;  %1793 = vmatprep.subr.bf16.mxu1 %v1859_v48 }
  0xaa   :  { %674 = vmatprep.mubr.f32.mxu0 %v143_v45 }
  0xab   :  { %1502 = vmatmul.mubr.msk.f32.gmra.mrb[48].mxu1 %vm250_vm1, %v137_v46 }
  0xac   :  { %1504 = vmatprep.mubr.msk.f32.mxu1 %vm1860_vm0, %v1861_v12 }
  0xad   :  { %675 = vmatmul.mubr.f32.gmra.mrb[50].mxu0 %v142_v47 }
  0xae   :  { %1539 = vmatprep.mubr.msk.f32.mxu0 %vm1860_vm0, %v1861_v12 }
  0xaf   :  { %1505 = vmatmul.mubr.msk.f32.gmra.mrb[50].mxu1 %vm250_vm1, %v144_v51 }
  0xb0   :  { %1610 = vmatprep.mubr.msk.f32.mxu1 %vm1860_vm0, %v1861_v12 }
 0x11c   :  { %v1210_v28 = vpop.f32.mrb[0].mxu0 }
 0x11d   :  { %v1211_v30 = vpop.f32.mrb[1].mxu0 }
 0x11e   :  { %v1281_v31 = vpop.f32.mrb[0].mxu1  ;;  %v1212_v33 = vadd.f32 %v1211_v30, %v1210_v28 }
 0x11f   :  { %v1282_v34 = vpop.f32.mrb[1].mxu1 }
 0x120   :  { %v1283_v37 = vadd.f32 %v1282_v34, %v1281_v31  ;;  %v357_v38 = vadd.f32 %v1212_v33, %v2070_v29  ;;  %v1213_v39 = vpop.f32.mrb[2].mxu0 }
 0x121   :  { %v1214_v40 = vpop.f32.mrb[3].mxu0 }
 0x122   :  { %v1284_v41 = vpop.f32.mrb[2].mxu1  ;;  %v2080_v43 = vadd.f32 %v1283_v37, %v357_v38  ;;  %v1215_v44 = vadd.f32 %v1214_v40, %v1213_v39 }
 0x123   :  { %v1285_v45 = vpop.f32.mrb[3].mxu1 }
 0x124   :  { %v1286_v46 = vadd.f32 %v1285_v45, %v1284_v41  ;;  %v362_v47 = vadd.f32 %v1215_v44, %v2070_v29  ;;  %v1216_v49 = vpop.f32.mrb[4].mxu0 }
 0x125   :  { %v1217_v50 = vpop.f32.mrb[5].mxu0 }
 0x126   :  { %v1287_v51 = vpop.f32.mrb[4].mxu1  ;;  %v2084_v52 = vadd.f32 %v1286_v46, %v362_v47  ;;  %v1218_v53 = vadd.f32 %v1217_v50, %v1216_v49 }
 0x127   :  { %v1288_v54 = vpop.f32.mrb[5].mxu1 }
 0x128   :  { %v1289_v55 = vadd.f32 %v1288_v54, %v1287_v51  ;;  %v367_v56 = vadd.f32 %v1218_v53, %v2070_v29  ;;  %v1219_v57 = vpop.f32.mrb[6].mxu0 }
 0x129   :  { %v1220_v58 = vpop.f32.mrb[7].mxu0 }
 0x12a   :  { %v1290_v59 = vpop.f32.mrb[6].mxu1  ;;  %v2088_v60 = vadd.f32 %v1289_v55, %v367_v56  ;;  %v1221_v61 = vadd.f32 %v1220_v58, %v1219_v57 }
 0x12b   :  { %v1291_v62 = vpop.f32.mrb[7].mxu1 }
 0x12c   :  { %v1292_v63 = vadd.f32 %v1291_v62, %v1290_v59  ;;  %v372_v0 = vadd.f32 %v1221_v61, %v2070_v29  ;;  %v1222_v1 = vpop.f32.mrb[8].mxu0 }
 0x12d   :  { %v1223_v2 = vpop.f32.mrb[9].mxu0 }
 0x12e   :  { %v1293_v3 = vpop.f32.mrb[8].mxu1  ;;  %v2091_v4 = vadd.f32 %v1292_v63, %v372_v0  ;;  %v1224_v5 = vadd.f32 %v1223_v2, %v1222_v1 }
 0x12f   :  { %v1294_v48 = vpop.f32.mrb[9].mxu1 }
 0x130   :  { %v1295_v6 = vadd.f32 %v1294_v48, %v1293_v3  ;;  %v377_v7 = vadd.f32 %v1224_v5, %v2070_v29  ;;  %v1225_v8 = vpop.f32.mrb[10].mxu0 }
 0x131   :  { %v1226_v9 = vpop.f32.mrb[11].mxu0 }
 0x132   :  { %v1296_v10 = vpop.f32.mrb[10].mxu1  ;;  %v2094_v11 = vadd.f32 %v1295_v6, %v377_v7  ;;  %v1227_v13 = vadd.f32 %v1226_v9, %v1225_v8 }
 0x133   :  { %v1297_v14 = vpop.f32.mrb[11].mxu1 }
 0x134   :  { %v1298_v15 = vadd.f32 %v1297_v14, %v1296_v10  ;;  %v382_v16 = vadd.f32 %v1227_v13, %v2070_v29  ;;  %v1228_v17 = vpop.f32.mrb[12].mxu0 }
 0x135   :  { %v1229_v18 = vpop.f32.mrb[13].mxu0 }
 0x136   :  { %v1299_v19 = vpop.f32.mrb[12].mxu1  ;;  %v2097_v20 = vadd.f32 %v1298_v15, %v382_v16  ;;  %v1230_v21 = vadd.f32 %v1229_v18, %v1228_v17 }
 0x137   :  { %v1300_v22 = vpop.f32.mrb[13].mxu1 }
 0x138   :  { %v1301_v23 = vadd.f32 %v1300_v22, %v1299_v19  ;;  %v387_v24 = vadd.f32 %v1230_v21, %v2070_v29  ;;  %v1231_v25 = vpop.f32.mrb[14].mxu0 }
 0x139   :  { %v1232_v26 = vpop.f32.mrb[15].mxu0 }
 0x13a   :  { %v1302_v27 = vpop.f32.mrb[14].mxu1  ;;  %v2100_v28 = vadd.f32 %v1301_v23, %v387_v24  ;;  %v1233_v30 = vadd.f32 %v1232_v26, %v1231_v25 }
 0x13b   :  { %v1303_v31 = vpop.f32.mrb[15].mxu1 }
 0x13c   :  { %v1304_v32 = vadd.f32 %v1303_v31, %v1302_v27  ;;  %v392_v33 = vadd.f32 %v1233_v30, %v2070_v29  ;;  %v1234_v34 = vpop.f32.mrb[16].mxu0 }
 0x13d   :  { %v1235_v35 = vpop.f32.mrb[17].mxu0 }
 0x13e   :  { %v1305_v36 = vpop.f32.mrb[16].mxu1  ;;  %v2103_v37 = vadd.f32 %v1304_v32, %v392_v33  ;;  %v1236_v38 = vadd.f32 %v1235_v35, %v1234_v34 }
 0x13f   :  { %v1306_v39 = vpop.f32.mrb[17].mxu1 }
 0x140   :  { %v1307_v40 = vadd.f32 %v1306_v39, %v1305_v36  ;;  %v397_v41 = vadd.f32 %v1236_v38, %v2070_v29  ;;  %v1237_v42 = vpop.f32.mrb[18].mxu0 }
 0x141   :  { %v1238_v44 = vpop.f32.mrb[19].mxu0 }
 0x142   :  { %v1308_v45 = vpop.f32.mrb[18].mxu1  ;;  %v2106_v46 = vadd.f32 %v1307_v40, %v397_v41  ;;  %v1239_v47 = vadd.f32 %v1238_v44, %v1237_v42 }
 0x143   :  { %v1309_v49 = vpop.f32.mrb[19].mxu1 }
 0x144   :  { %v1310_v50 = vadd.f32 %v1309_v49, %v1308_v45  ;;  %v402_v51 = vadd.f32 %v1239_v47, %v2070_v29  ;;  %v1240_v53 = vpop.f32.mrb[20].mxu0 }
 0x145   :  { %v1241_v54 = vpop.f32.mrb[21].mxu0 }
 0x146   :  { %v1311_v55 = vpop.f32.mrb[20].mxu1  ;;  %v2109_v56 = vadd.f32 %v1310_v50, %v402_v51  ;;  %v1242_v57 = vadd.f32 %v1241_v54, %v1240_v53 }
 0x147   :  { %v1312_v58 = vpop.f32.mrb[21].mxu1 }
 0x148   :  { %v1313_v59 = vadd.f32 %v1312_v58, %v1311_v55  ;;  %v407_v61 = vadd.f32 %v1242_v57, %v2070_v29  ;;  %v1243_v62 = vpop.f32.mrb[22].mxu0 }
 0x149   :  { %v1244_v63 = vpop.f32.mrb[23].mxu0 }
 0x14a   :  { %v1314_v0 = vpop.f32.mrb[22].mxu1  ;;  %v2112_v1 = vadd.f32 %v1313_v59, %v407_v61  ;;  %v1245_v2 = vadd.f32 %v1244_v63, %v1243_v62 }
 0x14b   :  { %v1315_v3 = vpop.f32.mrb[23].mxu1 }
 0x14c   :  { %v1316_v5 = vadd.f32 %v1315_v3, %v1314_v0  ;;  %v412_v48 = vadd.f32 %v1245_v2, %v2070_v29  ;;  %v1246_v6 = vpop.f32.mrb[24].mxu0 }
 0x14d   :  { %v1247_v7 = vpop.f32.mrb[25].mxu0 }
 0x14e   :  { %v1317_v8 = vpop.f32.mrb[24].mxu1  ;;  %v2115_v9 = vadd.f32 %v1316_v5, %v412_v48  ;;  %v1248_v10 = vadd.f32 %v1247_v7, %v1246_v6 }
 0x14f   :  { %v1318_v13 = vpop.f32.mrb[25].mxu1 }
 0x150   :  { %v1319_v14 = vadd.f32 %v1318_v13, %v1317_v8  ;;  %v417_v15 = vadd.f32 %v1248_v10, %v2070_v29  ;;  %v1352_v16 = vpop.f32.mrb[26].mxu0 }
 0x151   :  { %v1353_v17 = vpop.f32.mrb[27].mxu0 }
 0x152   :  { %v746_v18 = vpop.f32.mrb[26].mxu1  ;;  %v2118_v19 = vadd.f32 %v1319_v14, %v417_v15  ;;  %v1354_v21 = vadd.f32 %v1353_v17, %v1352_v16 }
 0x153   :  { %v1470_v22 = vpop.f32.mrb[27].mxu1 }
 0x154   :  { %v1355_v23 = vpop.f32.mrb[28].mxu0  ;;  %v617_v24 = vadd.f32 %v1354_v21, %v2080_v43 }
 0x155   :  { %v1356_v25 = vpop.f32.mrb[29].mxu0 }
 0x156   :  { %v751_v26 = vpop.f32.mrb[28].mxu1  ;;  %v1357_v27 = vadd.f32 %v1356_v25, %v1355_v23  ;;  %v747_v30 = vadd.f32 %v746_v18, %v617_v24 }
 0x157   :  { %v1473_v31 = vpop.f32.mrb[29].mxu1 }
 0x158   :  { %v810_v32 = vmax.f32 %v747_v30, 0.0  ;;  %v1358_v33 = vpop.f32.mrb[30].mxu0  ;;  %v622_v34 = vadd.f32 %v1357_v27, %v2084_v52 }
 0x159   :  { %v1359_v29 = vpop.f32.mrb[31].mxu0 }
 0x15a   :  { %v756_v35 = vpop.f32.mrb[30].mxu1  ;;  %v1360_v36 = vadd.f32 %v1359_v29, %v1358_v33  ;;  %v752_v38 = vadd.f32 %v751_v26, %v622_v34  ;;  %1540 = vmatmul.mubr.f32.vlgmr.msra.gmra.mrb[52].mxu0 %v810_v32 }
 0x15b   :  { %v1476_v39 = vpop.f32.mrb[31].mxu1  ;;  %1542 = vmatprep.mubr.msk.f32.mxu0 %vm1860_vm0, %v1861_v12 }
 0x15c   :  { %v811_v40 = vmax.f32 %v752_v38, 0.0  ;;  %v1361_v43 = vpop.f32.mrb[32].mxu0  ;;  %v627_v41 = vadd.f32 %v1360_v36, %v2088_v60 }
 0x15d   :  { %v1362_v42 = vpop.f32.mrb[33].mxu0 }
 0x15e   :  { %v761_v44 = vpop.f32.mrb[32].mxu1  ;;  %v1363_v45 = vadd.f32 %v1362_v42, %v1361_v43  ;;  %v757_v47 = vadd.f32 %v756_v35, %v627_v41  ;;  %1543 = vmatmul.mubr.f32.gmra.mrb[54].mxu0 %v811_v40 }
 0x15f   :  { %v1479_v49 = vpop.f32.mrb[33].mxu1  ;;  %1545 = vmatprep.mubr.msk.f32.mxu0 %vm1860_vm0, %v1861_v12 }
 0x160   :  { %v812_v52 = vmax.f32 %v757_v47, 0.0  ;;  %v1364_v50 = vpop.f32.mrb[34].mxu0  ;;  %v632_v51 = vadd.f32 %v1363_v45, %v2091_v4 }
 0x161   :  { %v1365_v53 = vpop.f32.mrb[35].mxu0 }
 0x162   :  { %v766_v54 = vpop.f32.mrb[34].mxu1  ;;  %v1366_v55 = vadd.f32 %v1365_v53, %v1364_v50  ;;  %v762_v57 = vadd.f32 %v761_v44, %v632_v51  ;;  %1546 = vmatmul.mubr.f32.gmra.mrb[56].mxu0 %v812_v52 }
 0x163   :  { %v1482_v58 = vpop.f32.mrb[35].mxu1  ;;  %1548 = vmatprep.mubr.msk.f32.mxu0 %vm1860_vm0, %v1861_v12 }
 0x164   :  { %v813_v60 = vmax.f32 %v762_v57, 0.0  ;;  %v1367_v59 = vpop.f32.mrb[36].mxu0  ;;  %v637_v61 = vadd.f32 %v1366_v55, %v2094_v11 }
 0x165   :  { %v1368_v62 = vpop.f32.mrb[37].mxu0 }
 0x166   :  { %v771_v63 = vpop.f32.mrb[36].mxu1  ;;  %v1369_v0 = vadd.f32 %v1368_v62, %v1367_v59  ;;  %v767_v2 = vadd.f32 %v766_v54, %v637_v61  ;;  %1549 = vmatmul.mubr.f32.gmra.mrb[58].mxu0 %v813_v60 }
 0x167   :  { %v1485_v3 = vpop.f32.mrb[37].mxu1  ;;  %1551 = vmatprep.mubr.msk.f32.mxu0 %vm1860_vm0, %v1861_v12 }
 0x168   :  { %v814_v4 = vmax.f32 %v767_v2, 0.0  ;;  %v1370_v5 = vpop.f32.mrb[38].mxu0  ;;  %v642_v48 = vadd.f32 %v1369_v0, %v2097_v20  ;;  %v1004_v3 = vld [vmem:[%s2265_s5 + $0x78] sm:$0xff] }
 0x169   :  { %v1371_v6 = vpop.f32.mrb[39].mxu0 }
 0x16a   :  { %v776_v7 = vpop.f32.mrb[38].mxu1  ;;  %v1372_v8 = vadd.f32 %v1371_v6, %v1370_v5  ;;  %v772_v10 = vadd.f32 %v771_v63, %v642_v48  ;;  %1552 = vmatmul.mubr.f32.gmra.mrb[60].mxu0 %v814_v4 }
 0x16b   :  { %v1488_v13 = vpop.f32.mrb[39].mxu1  ;;  %1554 = vmatprep.mubr.msk.f32.mxu0 %vm1860_vm0, %v1861_v12 }
 0x16c   :  { %v815_v11 = vmax.f32 %v772_v10, 0.0  ;;  %v1373_v14 = vpop.f32.mrb[40].mxu0  ;;  %v647_v15 = vadd.f32 %v1372_v8, %v2100_v28 }
 0x16d   :  { %v1374_v16 = vpop.f32.mrb[41].mxu0 }
 0x16e   :  { %v781_v17 = vpop.f32.mrb[40].mxu1  ;;  %v1375_v18 = vadd.f32 %v1374_v16, %v1373_v14  ;;  %v777_v21 = vadd.f32 %v776_v7, %v647_v15  ;;  %1555 = vmatmul.mubr.f32.gmra.mrb[62].mxu0 %v815_v11 }
 0x16f   :  { %v1491_v22 = vpop.f32.mrb[41].mxu1  ;;  %1557 = vmatprep.mubr.msk.f32.mxu0 %vm1860_vm0, %v1861_v12 }
 0x170   :  { %v816_v20 = vmax.f32 %v777_v21, 0.0  ;;  %v1376_v23 = vpop.f32.mrb[42].mxu0  ;;  %v652_v24 = vadd.f32 %v1375_v18, %v2103_v37 }
 0x171   :  { %v1377_v25 = vpop.f32.mrb[43].mxu0 }
 0x172   :  { %v786_v26 = vpop.f32.mrb[42].mxu1  ;;  %v1378_v27 = vadd.f32 %v1377_v25, %v1376_v23  ;;  %v782_v30 = vadd.f32 %v781_v17, %v652_v24  ;;  %1558 = vmatmul.mubr.f32.gmra.mrb[64].mxu0 %v816_v20 }
 0x173   :  { %v1494_v31 = vpop.f32.mrb[43].mxu1  ;;  %1560 = vmatprep.mubr.msk.f32.mxu0 %vm1860_vm0, %v1861_v12 }
 0x174   :  { %v817_v28 = vmax.f32 %v782_v30, 0.0  ;;  %v1379_v32 = vpop.f32.mrb[44].mxu0  ;;  %v657_v33 = vadd.f32 %v1378_v27, %v2106_v46 }
 0x175   :  { %v1380_v34 = vpop.f32.mrb[45].mxu0 }
 0x176   :  { %v791_v29 = vpop.f32.mrb[44].mxu1  ;;  %v1381_v35 = vadd.f32 %v1380_v34, %v1379_v32  ;;  %v787_v36 = vadd.f32 %v786_v26, %v657_v33  ;;  %1561 = vmatmul.mubr.f32.gmra.mrb[66].mxu0 %v817_v28 }
 0x177   :  { %v1497_v38 = vpop.f32.mrb[45].mxu1  ;;  %1563 = vmatprep.mubr.msk.f32.mxu0 %vm1860_vm0, %v1861_v12 }
 0x178   :  { %v818_v37 = vmax.f32 %v787_v36, 0.0  ;;  %v1382_v39 = vpop.f32.mrb[46].mxu0  ;;  %v662_v40 = vadd.f32 %v1381_v35, %v2109_v56 }
 0x179   :  { %v1383_v43 = vpop.f32.mrb[47].mxu0 }
 0x17a   :  { %v796_v41 = vpop.f32.mrb[46].mxu1  ;;  %v1384_v42 = vadd.f32 %v1383_v43, %v1382_v39  ;;  %v792_v44 = vadd.f32 %v791_v29, %v662_v40  ;;  %1564 = vmatmul.mubr.f32.gmra.mrb[68].mxu0 %v818_v37 }
 0x17b   :  { %v1500_v45 = vpop.f32.mrb[47].mxu1  ;;  %1566 = vmatprep.mubr.msk.f32.mxu0 %vm1860_vm0, %v1861_v12 }
 0x17c   :  { %v819_v46 = vmax.f32 %v792_v44, 0.0  ;;  %v1385_v47 = vpop.f32.mrb[48].mxu0  ;;  %v667_v49 = vadd.f32 %v1384_v42, %v2112_v1 }
 0x17d   :  { %v1386_v52 = vpop.f32.mrb[49].mxu0 }
 0x17e   :  { %v801_v50 = vpop.f32.mrb[48].mxu1  ;;  %v1387_v51 = vadd.f32 %v1386_v52, %v1385_v47  ;;  %v797_v53 = vadd.f32 %v796_v41, %v667_v49  ;;  %1567 = vmatmul.mubr.f32.gmra.mrb[70].mxu0 %v819_v46 }
 0x17f   :  { %v1503_v54 = vpop.f32.mrb[49].mxu1  ;;  %1569 = vmatprep.mubr.msk.f32.mxu0 %vm1860_vm0, %v1861_v12 }
 0x180   :  { %v820_v56 = vmax.f32 %v797_v53, 0.0  ;;  %v1388_v55 = vpop.f32.mrb[50].mxu0  ;;  %v672_v57 = vadd.f32 %v1387_v51, %v2115_v9  ;;  %v1003_v9 = vld [vmem:[%s2265_s5 + $0x70] sm:$0xff] }
 0x181   :  { %v1389_v58 = vpop.f32.mrb[51].mxu0  ;;  %v1794_v4 = vpack.c.bf16 %v1004_v3, %v1003_v9 }
 0x182   :  { %v806_v60 = vpop.f32.mrb[50].mxu1  ;;  %v1390_v59 = vadd.f32 %v1389_v58, %v1388_v55  ;;  %v802_v61 = vadd.f32 %v801_v50, %v672_v57  ;;  %1570 = vmatmul.mubr.f32.gmra.mrb[72].mxu0 %v820_v56 }
 0x183   :  { %v1506_v62 = vpop.f32.mrb[51].mxu1  ;;  %1572 = vmatprep.mubr.msk.f32.mxu0 %vm1860_vm0, %v1861_v12  ;;  %1795 = vmatpush3.bf16.msra.mxu1 %v1794_v4 }
 0x184   :  { %v821_v1 = vmax.f32 %v802_v61, 0.0  ;;  %v677_v63 = vadd.f32 %v1390_v59, %v2118_v19  ;;  %v2166_v19 = vld [vmem:[%s2264_s4] ss:$0 sm:$0xff] }
 0x185   :  { %v1177_v59 = vld [vmem:[%s2266_s6] ss:$0 sm:$0xff] }
 0x186   :  { %v807_v0 = vadd.f32 %v806_v60, %v677_v63  ;;  %1573 = vmatmul.mubr.f32.gmra.mrb[74].mxu0 %v821_v1 }
 0x187   :  { %1575 = vmatprep.mubr.msk.f32.mxu0 %vm1860_vm0, %v1861_v12 }
 0x188   :  { %v822_v2 = vmax.f32 %v807_v0, 0.0 }
 0x18a   :  { %1576 = vmatmul.mubr.f32.gmra.mrb[76].mxu0 %v822_v2 }
 0x22d   :  { %v912_v5 = vpop.f32.mrb[52].mxu0 }
 0x22e   :  { %v913_v48 = vadd.f32 %v2166_v19, %v912_v5  ;;  %v1541_v6 = vpop.f32.mrb[53].mxu0 }
 0x230   :  { %v976_v7 = vmax.f32 %v913_v48, 0.0 }
 0x231   :  { %v917_v8 = vpop.f32.mrb[54].mxu0 }
 0x232   :  { %v918_v10 = vadd.f32 %v2166_v19, %v917_v8  ;;  %v1544_v13 = vpop.f32.mrb[55].mxu0  ;;  %1611 = vmatmul.mubr.f32.vlgmr.msra.gmra.mrb[52].mxu1 %v976_v7 }
 0x233   :  { %1613 = vmatprep.mubr.msk.f32.mxu1 %vm1860_vm0, %v1861_v12 }
 0x234   :  { %v977_v11 = vmax.f32 %v918_v10, 0.0 }
 0x235   :  { %v922_v14 = vpop.f32.mrb[56].mxu0 }
 0x236   :  { %v923_v15 = vadd.f32 %v2166_v19, %v922_v14  ;;  %v1547_v16 = vpop.f32.mrb[57].mxu0  ;;  %1614 = vmatmul.mubr.f32.gmra.mrb[54].mxu1 %v977_v11 }
 0x237   :  { %1616 = vmatprep.mubr.msk.f32.mxu1 %vm1860_vm0, %v1861_v12 }
 0x238   :  { %v978_v17 = vmax.f32 %v923_v15, 0.0 }
 0x239   :  { %v927_v18 = vpop.f32.mrb[58].mxu0 }
 0x23a   :  { %v928_v21 = vadd.f32 %v2166_v19, %v927_v18  ;;  %v1550_v22 = vpop.f32.mrb[59].mxu0  ;;  %1617 = vmatmul.mubr.f32.gmra.mrb[56].mxu1 %v978_v17 }
 0x23b   :  { %1619 = vmatprep.mubr.msk.f32.mxu1 %vm1860_vm0, %v1861_v12 }
 0x23c   :  { %v979_v20 = vmax.f32 %v928_v21, 0.0 }
 0x23d   :  { %v932_v23 = vpop.f32.mrb[60].mxu0 }
 0x23e   :  { %v933_v24 = vadd.f32 %v2166_v19, %v932_v23  ;;  %v1553_v25 = vpop.f32.mrb[61].mxu0  ;;  %1620 = vmatmul.mubr.f32.gmra.mrb[58].mxu1 %v979_v20 }
 0x23f   :  { %1622 = vmatprep.mubr.msk.f32.mxu1 %vm1860_vm0, %v1861_v12 }
 0x240   :  { %v980_v26 = vmax.f32 %v933_v24, 0.0 }
 0x241   :  { %v937_v27 = vpop.f32.mrb[62].mxu0 }
 0x242   :  { %v938_v30 = vadd.f32 %v2166_v19, %v937_v27  ;;  %v1556_v31 = vpop.f32.mrb[63].mxu0  ;;  %1623 = vmatmul.mubr.f32.gmra.mrb[60].mxu1 %v980_v26 }
 0x243   :  { %1625 = vmatprep.mubr.msk.f32.mxu1 %vm1860_vm0, %v1861_v12 }
 0x244   :  { %v981_v28 = vmax.f32 %v938_v30, 0.0 }
 0x245   :  { %v942_v32 = vpop.f32.mrb[64].mxu0 }
 0x246   :  { %v943_v33 = vadd.f32 %v2166_v19, %v942_v32  ;;  %v1559_v34 = vpop.f32.mrb[65].mxu0  ;;  %1626 = vmatmul.mubr.f32.gmra.mrb[62].mxu1 %v981_v28 }
 0x247   :  { %1628 = vmatprep.mubr.msk.f32.mxu1 %vm1860_vm0, %v1861_v12 }
 0x248   :  { %v982_v29 = vmax.f32 %v943_v33, 0.0 }
 0x249   :  { %v947_v35 = vpop.f32.mrb[66].mxu0 }
 0x24a   :  { %v948_v36 = vadd.f32 %v2166_v19, %v947_v35  ;;  %v1562_v38 = vpop.f32.mrb[67].mxu0  ;;  %1629 = vmatmul.mubr.f32.gmra.mrb[64].mxu1 %v982_v29 }
 0x24b   :  { %1631 = vmatprep.mubr.msk.f32.mxu1 %vm1860_vm0, %v1861_v12 }
 0x24c   :  { %v983_v37 = vmax.f32 %v948_v36, 0.0 }
 0x24d   :  { %v952_v39 = vpop.f32.mrb[68].mxu0 }
 0x24e   :  { %v953_v40 = vadd.f32 %v2166_v19, %v952_v39  ;;  %v1565_v43 = vpop.f32.mrb[69].mxu0  ;;  %1632 = vmatmul.mubr.f32.gmra.mrb[66].mxu1 %v983_v37 }
 0x24f   :  { %1634 = vmatprep.mubr.msk.f32.mxu1 %vm1860_vm0, %v1861_v12 }
 0x250   :  { %v984_v41 = vmax.f32 %v953_v40, 0.0 }
 0x251   :  { %v957_v42 = vpop.f32.mrb[70].mxu0 }
 0x252   :  { %v958_v44 = vadd.f32 %v2166_v19, %v957_v42  ;;  %v1568_v45 = vpop.f32.mrb[71].mxu0  ;;  %1635 = vmatmul.mubr.f32.gmra.mrb[68].mxu1 %v984_v41 }
 0x253   :  { %1637 = vmatprep.mubr.msk.f32.mxu1 %vm1860_vm0, %v1861_v12 }
 0x254   :  { %v985_v46 = vmax.f32 %v958_v44, 0.0 }
 0x255   :  { %v962_v47 = vpop.f32.mrb[72].mxu0 }
 0x256   :  { %v963_v49 = vadd.f32 %v2166_v19, %v962_v47  ;;  %v1571_v52 = vpop.f32.mrb[73].mxu0  ;;  %1638 = vmatmul.mubr.f32.gmra.mrb[70].mxu1 %v985_v46 }
 0x257   :  { %1640 = vmatprep.mubr.msk.f32.mxu1 %vm1860_vm0, %v1861_v12 }
 0x258   :  { %v986_v50 = vmax.f32 %v963_v49, 0.0 }
 0x259   :  { %v967_v51 = vpop.f32.mrb[74].mxu0 }
 0x25a   :  { %v968_v53 = vadd.f32 %v2166_v19, %v967_v51  ;;  %v1574_v54 = vpop.f32.mrb[75].mxu0  ;;  %1641 = vmatmul.mubr.f32.gmra.mrb[72].mxu1 %v986_v50 }
 0x25b   :  { %1643 = vmatprep.mubr.msk.f32.mxu1 %vm1860_vm0, %v1861_v12 }
 0x25c   :  { %v987_v56 = vmax.f32 %v968_v53, 0.0 }
 0x25d   :  { %v972_v55 = vpop.f32.mrb[76].mxu0 }
 0x25e   :  { %v973_v57 = vadd.f32 %v2166_v19, %v972_v55  ;;  %v1577_v58 = vpop.f32.mrb[77].mxu0  ;;  %1644 = vmatmul.mubr.f32.gmra.mrb[74].mxu1 %v987_v56 }
 0x25f   :  { %1646 = vmatprep.mubr.msk.f32.mxu1 %vm1860_vm0, %v1861_v12 }
 0x260   :  { %v988_v60 = vmax.f32 %v973_v57, 0.0 }
 0x262   :  { %1647 = vmatmul.mubr.f32.gmra.mrb[76].mxu1 %v988_v60 }
 0x305   :  { %v1078_v61 = vpop.f32.mrb[52].mxu1 }
 0x306   :  { %v1079_v62 = vadd.f32 %v1177_v59, %v1078_v61  ;;  %v1612_v1 = vpop.f32.mrb[53].mxu1 }
 0x308   :  { %1143 = vst.msk [vmem:[%s2267_s7] sm:$0xff] %vm1142_vm2, %v1079_v62 }
 0x309   :  { %v1083_v63 = vpop.f32.mrb[54].mxu1 }
 0x30a   :  { %v1084_v0 = vadd.f32 %v1177_v59, %v1083_v63  ;;  %v1615_v2 = vpop.f32.mrb[55].mxu1 }
 0x30c   :  { %1144 = vst.msk [vmem:[%s2267_s7 + $0x8] sm:$0xff] %vm1142_vm2, %v1084_v0 }
 0x30d   :  { %v1088_v12 = vpop.f32.mrb[56].mxu1 }
 0x30e   :  { %v1089_v9 = vadd.f32 %v1177_v59, %v1088_v12  ;;  %v1618_v3 = vpop.f32.mrb[57].mxu1 }
 0x310   :  { %1145 = vst.msk [vmem:[%s2267_s7 + $0x10] sm:$0xff] %vm1142_vm2, %v1089_v9 }
 0x311   :  { %v1093_v4 = vpop.f32.mrb[58].mxu1 }
 0x312   :  { %v1094_v19 = vadd.f32 %v1177_v59, %v1093_v4  ;;  %v1621_v5 = vpop.f32.mrb[59].mxu1 }
 0x314   :  { %1146 = vst.msk [vmem:[%s2267_s7 + $0x18] sm:$0xff] %vm1142_vm2, %v1094_v19 }
 0x315   :  { %v1098_v48 = vpop.f32.mrb[60].mxu1 }
 0x316   :  { %v1099_v6 = vadd.f32 %v1177_v59, %v1098_v48  ;;  %v1624_v7 = vpop.f32.mrb[61].mxu1 }
 0x318   :  { %1147 = vst.msk [vmem:[%s2267_s7 + $0x20] sm:$0xff] %vm1142_vm2, %v1099_v6 }
 0x319   :  { %v1103_v8 = vpop.f32.mrb[62].mxu1 }
 0x31a   :  { %v1104_v10 = vadd.f32 %v1177_v59, %v1103_v8  ;;  %v1627_v13 = vpop.f32.mrb[63].mxu1 }
 0x31c   :  { %1148 = vst.msk [vmem:[%s2267_s7 + $0x28] sm:$0xff] %vm1142_vm2, %v1104_v10 }
 0x31d   :  { %v1108_v11 = vpop.f32.mrb[64].mxu1 }
 0x31e   :  { %v1109_v14 = vadd.f32 %v1177_v59, %v1108_v11  ;;  %v1630_v15 = vpop.f32.mrb[65].mxu1 }
 0x320   :  { %1149 = vst.msk [vmem:[%s2267_s7 + $0x30] sm:$0xff] %vm1142_vm2, %v1109_v14 }
 0x321   :  { %v1113_v16 = vpop.f32.mrb[66].mxu1 }
 0x322   :  { %v1114_v17 = vadd.f32 %v1177_v59, %v1113_v16  ;;  %v1633_v18 = vpop.f32.mrb[67].mxu1 }
 0x324   :  { %1150 = vst.msk [vmem:[%s2267_s7 + $0x38] sm:$0xff] %vm1142_vm2, %v1114_v17 }
 0x325   :  { %v1118_v21 = vpop.f32.mrb[68].mxu1 }
 0x326   :  { %v1119_v22 = vadd.f32 %v1177_v59, %v1118_v21  ;;  %v1636_v20 = vpop.f32.mrb[69].mxu1 }
 0x328   :  { %1151 = vst.msk [vmem:[%s2267_s7 + $0x40] sm:$0xff] %vm1142_vm2, %v1119_v22 }
 0x329   :  { %v1123_v23 = vpop.f32.mrb[70].mxu1 }
 0x32a   :  { %v1124_v24 = vadd.f32 %v1177_v59, %v1123_v23  ;;  %v1639_v25 = vpop.f32.mrb[71].mxu1 }
 0x32c   :  { %1152 = vst.msk [vmem:[%s2267_s7 + $0x48] sm:$0xff] %vm1142_vm2, %v1124_v24 }
 0x32d   :  { %v1128_v26 = vpop.f32.mrb[72].mxu1 }
 0x32e   :  { %v1129_v27 = vadd.f32 %v1177_v59, %v1128_v26  ;;  %v1642_v30 = vpop.f32.mrb[73].mxu1 }
 0x330   :  { %1153 = vst.msk [vmem:[%s2267_s7 + $0x50] sm:$0xff] %vm1142_vm2, %v1129_v27 }
 0x331   :  { %v1133_v31 = vpop.f32.mrb[74].mxu1 }
 0x332   :  { %v1134_v28 = vadd.f32 %v1177_v59, %v1133_v31  ;;  %v1645_v32 = vpop.f32.mrb[75].mxu1 }
 0x334   :  { %1154 = vst.msk [vmem:[%s2267_s7 + $0x58] sm:$0xff] %vm1142_vm2, %v1134_v28 }
 0x335   :  { %v1138_v33 = vpop.f32.mrb[76].mxu1 }
 0x336   :  { %v1139_v34 = vadd.f32 %v1177_v59, %v1138_v33  ;;  %v1648_v29 = vpop.f32.mrb[77].mxu1 }
 0x338   :  { %1155 = vst.msk [vmem:[%s2267_s7 + $0x60] sm:$0xff] %vm1142_vm2, %v1139_v34 }
 0x339   :  { %1160 = vsyncpa [#allocation3], 1 }
 0x33a   :  { %1161 = vsyncpa [#allocation5], 1 }

</bundles_post_ra>
